<compile_context>
chip_gen: v5e
topology: v5e:2x2
jax: 0.10.0
libtpu: 0.0.40
codegen_flags: <defaults>
</compile_context>

<pallas_src>
import functools

import jax
import jax.numpy as jnp
from jax import lax
from jax.experimental import pallas as pl
from jax.experimental.pallas import tpu as pltpu

EPS = 1e-5
SLOPE = 0.01                       # nn.LeakyReLU default negative_slope
VMEM_LIMIT = 48 * 1024 * 1024      # conservative: fits v7x's 64 MiB VMEM


# ---------------------------------------------------------------------------
# In-kernel helpers
# ---------------------------------------------------------------------------
def _lrelu(y):
    return jnp.where(y > 0, y, SLOPE * y)


def _norm(y, stats, inv_count):
    """Training-mode BatchNorm (gamma=1, beta=0) from accumulated sums.

    stats: (C, 2) -- column 0 = sum(y), column 1 = sum(y*y) over the batch.
    """
    mean = stats[:, 0:1] * inv_count
    var = jnp.maximum(stats[:, 1:2] * inv_count - mean * mean, 0.0)
    return (y - mean) * lax.rsqrt(var + EPS)


# ---------------------------------------------------------------------------
# Pallas kernels
# ---------------------------------------------------------------------------
def conv1x1_stats_kernel(x_ref, w_ref, st_ref):
    """Accumulate per-channel sum / sum-of-squares of y = W @ x over all tiles."""
    @pl.when((pl.program_id(0) == 0) & (pl.program_id(1) == 0))
    def _init():
        st_ref[...] = jnp.zeros_like(st_ref)

    y = jnp.dot(w_ref[...], x_ref[...], preferred_element_type=jnp.float32)
    s0 = jnp.sum(y, axis=1, keepdims=True)
    s1 = jnp.sum(y * y, axis=1, keepdims=True)
    st_ref[...] += jnp.concatenate([s0, s1], axis=1)


def conv1x1_bn_lrelu_kernel(x_ref, w_ref, st_ref, o_ref, *, inv_count):
    """o = LeakyReLU(BN(W @ x)) -- recomputes the cheap matmul, lane-dense out."""
    y = jnp.dot(w_ref[...], x_ref[...], preferred_element_type=jnp.float32)
    o_ref[...] = _lrelu(_norm(y, st_ref[...], inv_count))


def conv3x3_stats_kernel(h1p_ref, w2_ref, mask_ref, y2_ref, st_ref, *, tap_starts):
    """3x3 conv as 9 shifted in-VMEM matmul-accumulates + BN-stat accumulation.

    h1p_ref: (Cin, Lp)  zero-padded (parity-reordered for stride 2) image.
    w2_ref : (9, Cout, Cin) per-tap weights (resident).
    mask_ref: (1, Lout) 1.0 on valid output lanes, 0.0 on per-row junk pad.
    y2_ref : (Cout, Lout) raw (pre-BN) conv output, junk lanes zeroed.
    st_ref : (Cout, 2) resident accumulator of sum / sum-of-squares.
    """
    @pl.when(pl.program_id(0) == 0)
    def _init():
        st_ref[...] = jnp.zeros_like(st_ref)

    c_out, l_out = y2_ref.shape
    acc = jnp.zeros((c_out, l_out), jnp.float32)
    for t, start in enumerate(tap_starts):                 # 9 static taps
        rhs = h1p_ref[:, pl.ds(start, l_out)]              # contiguous window
        acc = acc + jnp.dot(w2_ref[t], rhs, preferred_element_type=jnp.float32)

    y = acc * mask_ref[...]
    y2_ref[...] = y
    s0 = jnp.sum(y, axis=1, keepdims=True)
    s1 = jnp.sum(y * y, axis=1, keepdims=True)
    st_ref[...] += jnp.concatenate([s0, s1], axis=1)


def bn_lrelu_mask_kernel(y_ref, st_ref, mask_ref, o_ref, *, inv_count):
    """h = LeakyReLU(BN(y)), with the junk pad lanes forced back to zero."""
    h = _lrelu(_norm(y_ref[...], st_ref[...], inv_count))
    o_ref[...] = h * mask_ref[...]


def final_kernel(h2_ref, w3_ref, st_ref, xs_ref, wsc_ref, o_ref, *, inv_count):
    """out = LeakyReLU(BN(W3 @ h2) + Wsc @ x_shortcut)."""
    y3 = jnp.dot(w3_ref[...], h2_ref[...], preferred_element_type=jnp.float32)
    res = _norm(y3, st_ref[...], inv_count)
    sc = jnp.dot(wsc_ref[...], xs_ref[...], preferred_element_type=jnp.float32)
    o_ref[...] = _lrelu(res + sc)


# ---------------------------------------------------------------------------
# pallas_call wrappers
# ---------------------------------------------------------------------------
def _cparams(sem):
    return pltpu.CompilerParams(dimension_semantics=sem,
                                vmem_limit_bytes=VMEM_LIMIT)


def _pick_tile(total, max_tile=2048):
    """Largest multiple-of-128 tile that divides `total` (else the full extent)."""
    best = total
    for t in range(128, min(total, max_tile) + 1, 128):
        if total % t == 0:
            best = t
    return best


def _conv1x1_stats(x_flat, w):
    n, cin, npix = x_flat.shape
    cout = w.shape[0]
    tp = _pick_tile(npix)
    return pl.pallas_call(
        conv1x1_stats_kernel,
        grid=(n, npix // tp),
        in_specs=[
            pl.BlockSpec((None, cin, tp), lambda i, j: (i, 0, j)),
            pl.BlockSpec((cout, cin), lambda i, j: (0, 0)),      # resident weights
        ],
        out_specs=pl.BlockSpec((cout, 2), lambda i, j: (0, 0)),  # resident accum
        out_shape=jax.ShapeDtypeStruct((cout, 2), jnp.float32),
        compiler_params=_cparams(("arbitrary", "arbitrary")),
    )(x_flat, w)


def _conv1x1_bn_lrelu(x_flat, w, stats, inv_count):
    n, cin, npix = x_flat.shape
    cout = w.shape[0]
    tp = _pick_tile(npix)
    return pl.pallas_call(
        functools.partial(conv1x1_bn_lrelu_kernel, inv_count=inv_count),
        grid=(n, npix // tp),
        in_specs=[
            pl.BlockSpec((None, cin, tp), lambda i, j: (i, 0, j)),
            pl.BlockSpec((cout, cin), lambda i, j: (0, 0)),
            pl.BlockSpec((cout, 2), lambda i, j: (0, 0)),
        ],
        out_specs=pl.BlockSpec((None, cout, tp), lambda i, j: (i, 0, j)),
        out_shape=jax.ShapeDtypeStruct((n, cout, npix), jnp.float32),
        compiler_params=_cparams(("parallel", "parallel")),
    )(x_flat, w, stats)


def _conv3x3_stats(h1p_flat, w2_taps, mask, tap_starts, l_out):
    n, cin, lp = h1p_flat.shape
    cout = w2_taps.shape[1]
    # TODO(synk): for very large H*W, add a row-band grid axis instead of one
    # whole padded image per grid step (fine for typical GAN feature maps).
    return pl.pallas_call(
        functools.partial(conv3x3_stats_kernel, tap_starts=tuple(tap_starts)),
        grid=(n,),
        in_specs=[
            pl.BlockSpec((None, cin, lp), lambda i: (i, 0, 0)),
            pl.BlockSpec((9, cout, cin), lambda i: (0, 0, 0)),
            pl.BlockSpec((1, l_out), lambda i: (0, 0)),
        ],
        out_specs=[
            pl.BlockSpec((None, cout, l_out), lambda i: (i, 0, 0)),
            pl.BlockSpec((cout, 2), lambda i: (0, 0)),
        ],
        out_shape=[
            jax.ShapeDtypeStruct((n, cout, l_out), jnp.float32),
            jax.ShapeDtypeStruct((cout, 2), jnp.float32),
        ],
        compiler_params=_cparams(("arbitrary",)),
    )(h1p_flat, w2_taps, mask)


def _bn_lrelu_mask(y, stats, mask, inv_count):
    n, c, l = y.shape
    return pl.pallas_call(
        functools.partial(bn_lrelu_mask_kernel, inv_count=inv_count),
        grid=(n,),
        in_specs=[
            pl.BlockSpec((None, c, l), lambda i: (i, 0, 0)),
            pl.BlockSpec((c, 2), lambda i: (0, 0)),
            pl.BlockSpec((1, l), lambda i: (0, 0)),
        ],
        out_specs=pl.BlockSpec((None, c, l), lambda i: (i, 0, 0)),
        out_shape=jax.ShapeDtypeStruct((n, c, l), jnp.float32),
        compiler_params=_cparams(("parallel",)),
    )(y, stats, mask)


def _final(h2, w3, stats3, xsp, wsc, inv_count):
    n, cin, l = h2.shape
    cout = w3.shape[0]
    return pl.pallas_call(
        functools.partial(final_kernel, inv_count=inv_count),
        grid=(n,),
        in_specs=[
            pl.BlockSpec((None, cin, l), lambda i: (i, 0, 0)),
            pl.BlockSpec((cout, cin), lambda i: (0, 0)),
            pl.BlockSpec((cout, 2), lambda i: (0, 0)),
            pl.BlockSpec((None, cin, l), lambda i: (i, 0, 0)),
            pl.BlockSpec((cout, cin), lambda i: (0, 0)),
        ],
        out_specs=pl.BlockSpec((None, cout, l), lambda i: (i, 0, 0)),
        out_shape=jax.ShapeDtypeStruct((n, cout, l), jnp.float32),
        compiler_params=_cparams(("parallel",)),
    )(h2, w3, stats3, xsp, wsc)


# ---------------------------------------------------------------------------
# Parameter init (mimics torch xavier_uniform_ on OIHW conv weights)
# ---------------------------------------------------------------------------
def _xavier_uniform(key, shape, gain):
    fan_in = shape[1] * shape[2] * shape[3]
    fan_out = shape[0] * shape[2] * shape[3]
    bound = gain * (6.0 / (fan_in + fan_out)) ** 0.5
    return jax.random.uniform(key, shape, jnp.float32, -bound, bound)


def init_params(key, in_channels, out_channels):
    k1, k2, k3, k4 = jax.random.split(key, 4)
    g = 2.0 ** 0.5
    return {
        "w1": _xavier_uniform(k1, (in_channels, in_channels, 1, 1), g),
        "w2": _xavier_uniform(k2, (in_channels, in_channels, 3, 3), g),
        "w3": _xavier_uniform(k3, (out_channels, in_channels, 1, 1), g),
        "wsc": _xavier_uniform(k4, (out_channels, in_channels, 1, 1), 1.0),
    }


# ---------------------------------------------------------------------------
# Forward pass
# ---------------------------------------------------------------------------
@functools.partial(jax.jit, static_argnames=("dsample",))
def disc_block2(x_nchw, params, dsample):
    stride = 2 if dsample else 1
    n, cin, h, w = x_nchw.shape
    ho = (h + 2 - 3) // stride + 1
    wo = (w + 2 - 3) // stride + 1
    wp = w + 2                       # padded row width == junk-padded out period
    l_out = ho * wp
    cout = params["w3"].shape[0]

    w1 = params["w1"][:, :, 0, 0]                                   # (Cin, Cin)
    w3 = params["w3"][:, :, 0, 0]                                   # (Cout, Cin)
    wsc = params["wsc"][:, :, 0, 0]                                 # (Cout, Cin)
    w2_taps = jnp.transpose(params["w2"], (2, 3, 0, 1)).reshape(9, cin, cin)

    # ---- stage 1: 1x1 conv -> BN -> LeakyReLU (two-pass BN, pixel-tiled) ----
    x_flat = x_nchw.reshape(n, cin, h * w)
    inv1 = 1.0 / float(n * h * w)
    stats1 = _conv1x1_stats(x_flat, w1)
    h1 = _conv1x1_bn_lrelu(x_flat, w1, stats1, inv1)                # (N,Cin,H*W)

    # ---- glue: zero-pad (and parity-reorder for stride 2) for the 3x3 conv ----
    # TODO(synk): this pad/reorder and the strided shortcut subsample below are
    # thin XLA glue (1x traffic); they could be folded into the kernels with
    # manual DMA / a strided index map.
    h1p = jnp.pad(h1.reshape(n, cin, h, w), ((0, 0), (0, 0), (1, 1), (1, 1)))
    if stride == 2:
        # even/odd reorder of padded rows & cols: every tap of the strided
        # 3x3 conv becomes a single contiguous flat slice inside the kernel.
        h1p = jnp.concatenate([h1p[:, :, 0::2, :], h1p[:, :, 1::2, :]], axis=2)
        h1p = jnp.concatenate([h1p[:, :, :, 0::2], h1p[:, :, :, 1::2]], axis=3)
        he, we = (h + 3) // 2, (w + 3) // 2
        row_off = {0: 0, 1: he, 2: 1}
        col_off = {0: 0, 1: we, 2: 1}
    else:
        row_off = {0: 0, 1: 1, 2: 2}
        col_off = {0: 0, 1: 1, 2: 2}
    h1p = jnp.pad(h1p, ((0, 0), (0, 0), (0, 2), (0, 0)))            # slack rows
    h1p_flat = h1p.reshape(n, cin, h1p.shape[2] * wp)
    tap_starts = tuple(row_off[kh] * wp + col_off[kw]
                       for kh in range(3) for kw in range(3))

    # 1.0 on real output pixels, 0.0 on the per-row junk padding lanes.
    mask = ((jnp.arange(l_out) % wp) < wo).astype(jnp.float32).reshape(1, l_out)
    inv_out = 1.0 / float(n * ho * wo)

    # ---- stage 2: 3x3 conv (+BN stats) then BN -> LeakyReLU ----
    y2, stats2 = _conv3x3_stats(h1p_flat, w2_taps, mask, tap_starts, l_out)
    h2 = _bn_lrelu_mask(y2, stats2, mask, inv_out)                  # (N,Cin,Ho*Wp)

    # ---- stage 3: 1x1 conv -> BN, shortcut 1x1(stride), add, LeakyReLU ----
    stats3 = _conv1x1_stats(h2, w3)
    x_sub = x_nchw[:, :, ::stride, ::stride]
    xsp = jnp.pad(x_sub, ((0, 0), (0, 0), (0, 0), (0, wp - wo)))
    xsp = xsp.reshape(n, cin, l_out)
    out = _final(h2, w3, stats3, xsp, wsc, inv_out)                 # (N,Cout,Ho*Wp)

    return out.reshape(n, cout, ho, wp)[:, :, :, :wo]               # NCHW


# ---------------------------------------------------------------------------
# Pure-JAX reference (training-mode BN), for the correctness check
# ---------------------------------------------------------------------------
def reference(x_nchw, params, dsample):
    stride = 2 if dsample else 1

    def conv(x, wgt, s, p):
        return lax.conv_general_dilated(x, wgt, (s, s), [(p, p), (p, p)],
                                        dimension_numbers=("NCHW", "OIHW", "NCHW"))

    def bn(x):
        mean = jnp.mean(x, axis=(0, 2, 3), keepdims=True)
        var = jnp.mean(jnp.square(x - mean), axis=(0, 2, 3), keepdims=True)
        return (x - mean) * lax.rsqrt(var + EPS)

    def lr(x):
        return jnp.where(x > 0, x, SLOPE * x)

    hh = lr(bn(conv(x_nchw, params["w1"], 1, 0)))
    hh = lr(bn(conv(hh, params["w2"], stride, 1)))
    hh = bn(conv(hh, params["w3"], 1, 0))
    sc = conv(x_nchw, params["wsc"], stride, 0)
    return lr(hh + sc)


# ---------------------------------------------------------------------------
if __name__ == "__main__":
    key = jax.random.PRNGKey(0)
    kx, kp = jax.random.split(key)

    batch, in_channels, out_channels, spatial = 2, 4, 8, 16
    x = jax.random.normal(kx, (batch, in_channels, spatial, spatial), jnp.float32)
    params = init_params(kp, in_channels, out_channels)

    for dsample in (True, False):
        out = jax.block_until_ready(disc_block2(x, params, dsample))
        ref = jax.block_until_ready(reference(x, params, dsample))
        assert out.shape == ref.shape, (out.shape, ref.shape)
        err = float(jnp.max(jnp.abs(out - ref)))
        assert jnp.allclose(out, ref, atol=2e-4, rtol=2e-4), (
            f"mismatch vs JAX reference (dsample={dsample}), max err {err}")

    print("KERNEL_OK")
</pallas_src>

<mosaic_0001>
module attributes {stable_mosaic.version = 11 : i64} {
  func.func @conv1x1_stats_kernel(%arg0: i32, %arg1: i32, %arg2: memref<1x4x256xf32, #tpu.memory_space<vmem>>, %arg3: memref<4x4xf32, #tpu.memory_space<vmem>>, %arg4: memref<4x2xf32, #tpu.memory_space<vmem>>) attributes {dimension_semantics = [#tpu.dimension_semantics<arbitrary>, #tpu.dimension_semantics<arbitrary>], iteration_bounds = array<i64: 2, 1>, scalar_prefetch = 0 : i64, scratch_operands = 0 : i64, tpu.core_type = #tpu.core_type<tc>, window_params = [{transform_indices = @transform_0, window_bounds = array<i64: 1, 4, 256>}, {pipeline_mode = #tpu.pipeline_mode<synchronous>, transform_indices = @transform_1, window_bounds = array<i64: 4, 4>}, {pipeline_mode = #tpu.pipeline_mode<synchronous>, transform_indices = @transform_2, window_bounds = array<i64: 4, 2>}]} {
    %c0_i32 = arith.constant 0 : i32
    %0 = arith.cmpi eq, %arg0, %c0_i32 : i32
    %c0_i32_0 = arith.constant 0 : i32
    %1 = arith.cmpi eq, %arg1, %c0_i32_0 : i32
    %2 = arith.andi %0, %1 : i1
    %3 = arith.extui %2 : i1 to i32
    %c0_i32_1 = arith.constant 0 : i32
    %4 = arith.cmpi ne, %3, %c0_i32_1 : i32
    scf.if %4 {
      %cst_12 = arith.constant 0.000000e+00 : f32
      %18 = vector.broadcast %cst_12 : f32 to vector<4x2xf32>
      %c0_13 = arith.constant 0 : index
      %c0_14 = arith.constant 0 : index
      %19 = vector.load %arg4[%c0_13, %c0_14] : memref<4x2xf32, #tpu.memory_space<vmem>>, vector<4x2xf32>
      tpu.vector_store %arg4[%c0_13, %c0_14], %18 {strides = array<i32>} : memref<4x2xf32, #tpu.memory_space<vmem>>, vector<4x2xf32>,
    } else {
    }
    %c0 = arith.constant 0 : index
    %c0_2 = arith.constant 0 : index
    %5 = vector.load %arg3[%c0, %c0_2] : memref<4x4xf32, #tpu.memory_space<vmem>>, vector<4x4xf32>
    %c0_3 = arith.constant 0 : index
    %c0_4 = arith.constant 0 : index
    %c0_5 = arith.constant 0 : index
    %6 = vector.load %arg2[%c0_3, %c0_4, %c0_5] : memref<1x4x256xf32, #tpu.memory_space<vmem>>, vector<1x4x256xf32>
    %7 = vector.shape_cast %6 : vector<1x4x256xf32> to vector<4x256xf32>
    %cst = arith.constant dense<0.000000e+00> : vector<4x256xf32>
    %8 = tpu.matmul %5, %7, %cst {dimension_numbers = #tpu.dot_dimension_numbers<[1], [0], [0], [1], [0, 0, 1, 1], [], []>} : vector<4x4xf32>, vector<4x256xf32>, vector<4x256xf32> -> vector<4x256xf32>
    %cst_6 = arith.constant dense<0.000000e+00> : vector<4xf32>
    %9 = vector.multi_reduction <add>, %8, %cst_6 [1] : vector<4x256xf32> to vector<4xf32>
    %10 = vector.shape_cast %9 : vector<4xf32> to vector<4x1xf32>
    %11 = arith.mulf %8, %8 : vector<4x256xf32>
    %cst_7 = arith.constant dense<0.000000e+00> : vector<4xf32>
    %12 = vector.multi_reduction <add>, %11, %cst_7 [1] : vector<4x256xf32> to vector<4xf32>
    %13 = vector.shape_cast %12 : vector<4xf32> to vector<4x1xf32>
    %c0_8 = arith.constant 0 : index
    %c0_9 = arith.constant 0 : index
    %14 = vector.load %arg4[%c0_8, %c0_9] : memref<4x2xf32, #tpu.memory_space<vmem>>, vector<4x2xf32>
    %15 = tpu.concatenate %10, %13 in 1 : vector<4x1xf32>, vector<4x1xf32> -> vector<4x2xf32>
    %16 = arith.addf %14, %15 : vector<4x2xf32>
    %c0_10 = arith.constant 0 : index
    %c0_11 = arith.constant 0 : index
    %17 = vector.load %arg4[%c0_10, %c0_11] : memref<4x2xf32, #tpu.memory_space<vmem>>, vector<4x2xf32>
    tpu.vector_store %arg4[%c0_10, %c0_11], %16 {strides = array<i32>} : memref<4x2xf32, #tpu.memory_space<vmem>>, vector<4x2xf32>,
    return
  }
  func.func @transform_0(%arg0: i32, %arg1: i32) -> (i32, i32, i32) {
    %c0_i32 = arith.constant 0 : i32
    %c0_i32_0 = arith.constant 0 : i32
    return %arg0, %c0_i32, %arg1 : i32, i32, i32
  }
  func.func @transform_1(%arg0: i32, %arg1: i32) -> (i32, i32) {
    %c0_i32 = arith.constant 0 : i32
    %c0_i32_0 = arith.constant 0 : i32
    %c0_i32_1 = arith.constant 0 : i32
    return %c0_i32, %c0_i32_0 : i32, i32
  }
  func.func @transform_2(%arg0: i32, %arg1: i32) -> (i32, i32) {
    %c0_i32 = arith.constant 0 : i32
    %c0_i32_0 = arith.constant 0 : i32
    %c0_i32_1 = arith.constant 0 : i32
    return %c0_i32, %c0_i32_0 : i32, i32
  }
}

module attributes {stable_mosaic.version = 11 : i64} {
  func.func @conv1x1_bn_lrelu_kernel(%arg0: i32, %arg1: i32, %arg2: memref<1x4x256xf32, #tpu.memory_space<vmem>>, %arg3: memref<4x4xf32, #tpu.memory_space<vmem>>, %arg4: memref<4x2xf32, #tpu.memory_space<vmem>>, %arg5: memref<1x4x256xf32, #tpu.memory_space<vmem>>) attributes {dimension_semantics = [#tpu.dimension_semantics<parallel>, #tpu.dimension_semantics<parallel>], iteration_bounds = array<i64: 2, 1>, scalar_prefetch = 0 : i64, scratch_operands = 0 : i64, tpu.core_type = #tpu.core_type<tc>, window_params = [{transform_indices = @transform_0, window_bounds = array<i64: 1, 4, 256>}, {pipeline_mode = #tpu.pipeline_mode<synchronous>, transform_indices = @transform_1, window_bounds = array<i64: 4, 4>}, {pipeline_mode = #tpu.pipeline_mode<synchronous>, transform_indices = @transform_2, window_bounds = array<i64: 4, 2>}, {transform_indices = @transform_3, window_bounds = array<i64: 1, 4, 256>}]} {
    %c0 = arith.constant 0 : index
    %c0_0 = arith.constant 0 : index
    %0 = vector.load %arg3[%c0, %c0_0] : memref<4x4xf32, #tpu.memory_space<vmem>>, vector<4x4xf32>
    %c0_1 = arith.constant 0 : index
    %c0_2 = arith.constant 0 : index
    %c0_3 = arith.constant 0 : index
    %1 = vector.load %arg2[%c0_1, %c0_2, %c0_3] : memref<1x4x256xf32, #tpu.memory_space<vmem>>, vector<1x4x256xf32>
    %2 = vector.shape_cast %1 : vector<1x4x256xf32> to vector<4x256xf32>
    %cst = arith.constant dense<0.000000e+00> : vector<4x256xf32>
    %3 = tpu.matmul %0, %2, %cst {dimension_numbers = #tpu.dot_dimension_numbers<[1], [0], [0], [1], [0, 0, 1, 1], [], []>} : vector<4x4xf32>, vector<4x256xf32>, vector<4x256xf32> -> vector<4x256xf32>
    %c0_4 = arith.constant 0 : index
    %c0_5 = arith.constant 0 : index
    %4 = vector.load %arg4[%c0_4, %c0_5] : memref<4x2xf32, #tpu.memory_space<vmem>>, vector<4x2xf32>
    %5 = vector.extract_strided_slice %4 {offsets = [0, 0], sizes = [4, 1], strides = [1, 1]} : vector<4x2xf32> to vector<4x1xf32>
    %cst_6 = arith.constant 0.001953125 : f32
    %6 = vector.broadcast %cst_6 : f32 to vector<4x1xf32>
    %7 = arith.mulf %5, %6 : vector<4x1xf32>
    %8 = vector.extract_strided_slice %4 {offsets = [0, 1], sizes = [4, 1], strides = [1, 1]} : vector<4x2xf32> to vector<4x1xf32>
    %cst_7 = arith.constant 0.001953125 : f32
    %9 = vector.broadcast %cst_7 : f32 to vector<4x1xf32>
    %10 = arith.mulf %8, %9 : vector<4x1xf32>
    %11 = arith.mulf %7, %7 : vector<4x1xf32>
    %12 = arith.subf %10, %11 : vector<4x1xf32>
    %cst_8 = arith.constant 0.000000e+00 : f32
    %13 = vector.broadcast %cst_8 : f32 to vector<4x1xf32>
    %14 = arith.maximumf %12, %13 : vector<4x1xf32>
    %15 = vector.broadcast %7 : vector<4x1xf32> to vector<4x256xf32>
    %16 = arith.subf %3, %15 : vector<4x256xf32>
    %cst_9 = arith.constant 9.99999974E-6 : f32
    %17 = vector.broadcast %cst_9 : f32 to vector<4x1xf32>
    %18 = arith.addf %14, %17 : vector<4x1xf32>
    %19 = math.rsqrt %18 : vector<4x1xf32>
    %20 = vector.broadcast %19 : vector<4x1xf32> to vector<4x256xf32>
    %21 = arith.mulf %16, %20 : vector<4x256xf32>
    %cst_10 = arith.constant 0.000000e+00 : f32
    %22 = vector.broadcast %cst_10 : f32 to vector<4x256xf32>
    %23 = arith.cmpf ogt, %21, %22 : vector<4x256xf32>
    %cst_11 = arith.constant 0.00999999977 : f32
    %24 = vector.broadcast %cst_11 : f32 to vector<4x256xf32>
    %25 = arith.mulf %24, %21 : vector<4x256xf32>
    %26 = arith.select %23, %21, %25 : vector<4x256xi1>, vector<4x256xf32>
    %c0_12 = arith.constant 0 : index
    %c0_13 = arith.constant 0 : index
    %c0_14 = arith.constant 0 : index
    %27 = vector.load %arg5[%c0_12, %c0_13, %c0_14] : memref<1x4x256xf32, #tpu.memory_space<vmem>>, vector<1x4x256xf32>
    %28 = vector.shape_cast %27 : vector<1x4x256xf32> to vector<4x256xf32>
    %29 = vector.shape_cast %26 : vector<4x256xf32> to vector<1x4x256xf32>
    tpu.vector_store %arg5[%c0_12, %c0_13, %c0_14], %29 {strides = array<i32>} : memref<1x4x256xf32, #tpu.memory_space<vmem>>, vector<1x4x256xf32>,
    return
  }
  func.func @transform_0(%arg0: i32, %arg1: i32) -> (i32, i32, i32) {
    %c0_i32 = arith.constant 0 : i32
    %c0_i32_0 = arith.constant 0 : i32
    return %arg0, %c0_i32, %arg1 : i32, i32, i32
  }
  func.func @transform_1(%arg0: i32, %arg1: i32) -> (i32, i32) {
    %c0_i32 = arith.constant 0 : i32
    %c0_i32_0 = arith.constant 0 : i32
    %c0_i32_1 = arith.constant 0 : i32
    return %c0_i32, %c0_i32_0 : i32, i32
  }
  func.func @transform_2(%arg0: i32, %arg1: i32) -> (i32, i32) {
    %c0_i32 = arith.constant 0 : i32
    %c0_i32_0 = arith.constant 0 : i32
    %c0_i32_1 = arith.constant 0 : i32
    return %c0_i32, %c0_i32_0 : i32, i32
  }
  func.func @transform_3(%arg0: i32, %arg1: i32) -> (i32, i32, i32) {
    %c0_i32 = arith.constant 0 : i32
    %c0_i32_0 = arith.constant 0 : i32
    return %arg0, %c0_i32, %arg1 : i32, i32, i32
  }
}

module attributes {stable_mosaic.version = 11 : i64} {
  func.func @conv3x3_stats_kernel(%arg0: i32, %arg1: memref<1x4x360xf32, #tpu.memory_space<vmem>>, %arg2: memref<9x4x4xf32, #tpu.memory_space<vmem>>, %arg3: memref<1x144xf32, #tpu.memory_space<vmem>>, %arg4: memref<1x4x144xf32, #tpu.memory_space<vmem>>, %arg5: memref<4x2xf32, #tpu.memory_space<vmem>>) attributes {dimension_semantics = [#tpu.dimension_semantics<arbitrary>], iteration_bounds = array<i64: 2>, scalar_prefetch = 0 : i64, scratch_operands = 0 : i64, tpu.core_type = #tpu.core_type<tc>, window_params = [{transform_indices = @transform_0, window_bounds = array<i64: 1, 4, 360>}, {pipeline_mode = #tpu.pipeline_mode<synchronous>, transform_indices = @transform_1, window_bounds = array<i64: 9, 4, 4>}, {pipeline_mode = #tpu.pipeline_mode<synchronous>, transform_indices = @transform_2, window_bounds = array<i64: 1, 144>}, {transform_indices = @transform_3, window_bounds = array<i64: 1, 4, 144>}, {pipeline_mode = #tpu.pipeline_mode<synchronous>, transform_indices = @transform_4, window_bounds = array<i64: 4, 2>}]} {
    %c0_i32 = arith.constant 0 : i32
    %0 = arith.cmpi eq, %arg0, %c0_i32 : i32
    %1 = arith.extui %0 : i1 to i32
    %c0_i32_0 = arith.constant 0 : i32
    %2 = arith.cmpi ne, %1, %c0_i32_0 : i32
    scf.if %2 {
      %cst_59 = arith.constant 0.000000e+00 : f32
      %73 = vector.broadcast %cst_59 : f32 to vector<4x2xf32>
      %c0_60 = arith.constant 0 : index
      %c0_61 = arith.constant 0 : index
      %74 = vector.load %arg5[%c0_60, %c0_61] : memref<4x2xf32, #tpu.memory_space<vmem>>, vector<4x2xf32>
      tpu.vector_store %arg5[%c0_60, %c0_61], %73 {strides = array<i32>} : memref<4x2xf32, #tpu.memory_space<vmem>>, vector<4x2xf32>,
    } else {
    }
    %cst = arith.constant 0.000000e+00 : f32
    %3 = vector.broadcast %cst : f32 to vector<4x144xf32>
    %c0 = arith.constant 0 : index
    %c0_1 = arith.constant 0 : index
    %c0_2 = arith.constant 0 : index
    %4 = vector.load %arg1[%c0, %c0_1, %c0_2] : memref<1x4x360xf32, #tpu.memory_space<vmem>>, vector<1x4x144xf32>
    %5 = vector.shape_cast %4 : vector<1x4x144xf32> to vector<4x144xf32>
    %c0_3 = arith.constant 0 : index
    %c0_4 = arith.constant 0 : index
    %c0_5 = arith.constant 0 : index
    %6 = vector.load %arg2[%c0_3, %c0_4, %c0_5] : memref<9x4x4xf32, #tpu.memory_space<vmem>>, vector<1x4x4xf32>
    %7 = vector.shape_cast %6 : vector<1x4x4xf32> to vector<4x4xf32>
    %cst_6 = arith.constant dense<0.000000e+00> : vector<4x144xf32>
    %8 = tpu.matmul %7, %5, %cst_6 {dimension_numbers = #tpu.dot_dimension_numbers<[1], [0], [0], [1], [0, 0, 1, 1], [], []>} : vector<4x4xf32>, vector<4x144xf32>, vector<4x144xf32> -> vector<4x144xf32>
    %9 = arith.addf %3, %8 : vector<4x144xf32>
    %c0_7 = arith.constant 0 : index
    %c0_8 = arith.constant 0 : index
    %c9 = arith.constant 9 : index
    %10 = vector.load %arg1[%c0_7, %c0_8, %c9] : memref<1x4x360xf32, #tpu.memory_space<vmem>>, vector<1x4x144xf32>
    %11 = vector.shape_cast %10 : vector<1x4x144xf32> to vector<4x144xf32>
    %c1 = arith.constant 1 : index
    %c0_9 = arith.constant 0 : index
    %c0_10 = arith.constant 0 : index
    %12 = vector.load %arg2[%c1, %c0_9, %c0_10] : memref<9x4x4xf32, #tpu.memory_space<vmem>>, vector<1x4x4xf32>
    %13 = vector.shape_cast %12 : vector<1x4x4xf32> to vector<4x4xf32>
    %cst_11 = arith.constant dense<0.000000e+00> : vector<4x144xf32>
    %14 = tpu.matmul %13, %11, %cst_11 {dimension_numbers = #tpu.dot_dimension_numbers<[1], [0], [0], [1], [0, 0, 1, 1], [], []>} : vector<4x4xf32>, vector<4x144xf32>, vector<4x144xf32> -> vector<4x144xf32>
    %15 = arith.addf %9, %14 : vector<4x144xf32>
    %c0_12 = arith.constant 0 : index
    %c0_13 = arith.constant 0 : index
    %c1_14 = arith.constant 1 : index
    %16 = vector.load %arg1[%c0_12, %c0_13, %c1_14] : memref<1x4x360xf32, #tpu.memory_space<vmem>>, vector<1x4x144xf32>
    %17 = vector.shape_cast %16 : vector<1x4x144xf32> to vector<4x144xf32>
    %c2 = arith.constant 2 : index
    %c0_15 = arith.constant 0 : index
    %c0_16 = arith.constant 0 : index
    %18 = vector.load %arg2[%c2, %c0_15, %c0_16] : memref<9x4x4xf32, #tpu.memory_space<vmem>>, vector<1x4x4xf32>
    %19 = vector.shape_cast %18 : vector<1x4x4xf32> to vector<4x4xf32>
    %cst_17 = arith.constant dense<0.000000e+00> : vector<4x144xf32>
    %20 = tpu.matmul %19, %17, %cst_17 {dimension_numbers = #tpu.dot_dimension_numbers<[1], [0], [0], [1], [0, 0, 1, 1], [], []>} : vector<4x4xf32>, vector<4x144xf32>, vector<4x144xf32> -> vector<4x144xf32>
    %21 = arith.addf %15, %20 : vector<4x144xf32>
    %c0_18 = arith.constant 0 : index
    %c0_19 = arith.constant 0 : index
    %c162 = arith.constant 162 : index
    %22 = vector.load %arg1[%c0_18, %c0_19, %c162] : memref<1x4x360xf32, #tpu.memory_space<vmem>>, vector<1x4x144xf32>
    %23 = vector.shape_cast %22 : vector<1x4x144xf32> to vector<4x144xf32>
    %c3 = arith.constant 3 : index
    %c0_20 = arith.constant 0 : index
    %c0_21 = arith.constant 0 : index
    %24 = vector.load %arg2[%c3, %c0_20, %c0_21] : memref<9x4x4xf32, #tpu.memory_space<vmem>>, vector<1x4x4xf32>
    %25 = vector.shape_cast %24 : vector<1x4x4xf32> to vector<4x4xf32>
    %cst_22 = arith.constant dense<0.000000e+00> : vector<4x144xf32>
    %26 = tpu.matmul %25, %23, %cst_22 {dimension_numbers = #tpu.dot_dimension_numbers<[1], [0], [0], [1], [0, 0, 1, 1], [], []>} : vector<4x4xf32>, vector<4x144xf32>, vector<4x144xf32> -> vector<4x144xf32>
    %27 = arith.addf %21, %26 : vector<4x144xf32>
    %c0_23 = arith.constant 0 : index
    %c0_24 = arith.constant 0 : index
    %c171 = arith.constant 171 : index
    %28 = vector.load %arg1[%c0_23, %c0_24, %c171] : memref<1x4x360xf32, #tpu.memory_space<vmem>>, vector<1x4x144xf32>
    %29 = vector.shape_cast %28 : vector<1x4x144xf32> to vector<4x144xf32>
    %c4 = arith.constant 4 : index
    %c0_25 = arith.constant 0 : index
    %c0_26 = arith.constant 0 : index
    %30 = vector.load %arg2[%c4, %c0_25, %c0_26] : memref<9x4x4xf32, #tpu.memory_space<vmem>>, vector<1x4x4xf32>
    %31 = vector.shape_cast %30 : vector<1x4x4xf32> to vector<4x4xf32>
    %cst_27 = arith.constant dense<0.000000e+00> : vector<4x144xf32>
    %32 = tpu.matmul %31, %29, %cst_27 {dimension_numbers = #tpu.dot_dimension_numbers<[1], [0], [0], [1], [0, 0, 1, 1], [], []>} : vector<4x4xf32>, vector<4x144xf32>, vector<4x144xf32> -> vector<4x144xf32>
    %33 = arith.addf %27, %32 : vector<4x144xf32>
    %c0_28 = arith.constant 0 : index
    %c0_29 = arith.constant 0 : index
    %c163 = arith.constant 163 : index
    %34 = vector.load %arg1[%c0_28, %c0_29, %c163] : memref<1x4x360xf32, #tpu.memory_space<vmem>>, vector<1x4x144xf32>
    %35 = vector.shape_cast %34 : vector<1x4x144xf32> to vector<4x144xf32>
    %c5 = arith.constant 5 : index
    %c0_30 = arith.constant 0 : index
    %c0_31 = arith.constant 0 : index
    %36 = vector.load %arg2[%c5, %c0_30, %c0_31] : memref<9x4x4xf32, #tpu.memory_space<vmem>>, vector<1x4x4xf32>
    %37 = vector.shape_cast %36 : vector<1x4x4xf32> to vector<4x4xf32>
    %cst_32 = arith.constant dense<0.000000e+00> : vector<4x144xf32>
    %38 = tpu.matmul %37, %35, %cst_32 {dimension_numbers = #tpu.dot_dimension_numbers<[1], [0], [0], [1], [0, 0, 1, 1], [], []>} : vector<4x4xf32>, vector<4x144xf32>, vector<4x144xf32> -> vector<4x144xf32>
    %39 = arith.addf %33, %38 : vector<4x144xf32>
    %c0_33 = arith.constant 0 : index
    %c0_34 = arith.constant 0 : index
    %c18 = arith.constant 18 : index
    %40 = vector.load %arg1[%c0_33, %c0_34, %c18] : memref<1x4x360xf32, #tpu.memory_space<vmem>>, vector<1x4x144xf32>
    %41 = vector.shape_cast %40 : vector<1x4x144xf32> to vector<4x144xf32>
    %c6 = arith.constant 6 : index
    %c0_35 = arith.constant 0 : index
    %c0_36 = arith.constant 0 : index
    %42 = vector.load %arg2[%c6, %c0_35, %c0_36] : memref<9x4x4xf32, #tpu.memory_space<vmem>>, vector<1x4x4xf32>
    %43 = vector.shape_cast %42 : vector<1x4x4xf32> to vector<4x4xf32>
    %cst_37 = arith.constant dense<0.000000e+00> : vector<4x144xf32>
    %44 = tpu.matmul %43, %41, %cst_37 {dimension_numbers = #tpu.dot_dimension_numbers<[1], [0], [0], [1], [0, 0, 1, 1], [], []>} : vector<4x4xf32>, vector<4x144xf32>, vector<4x144xf32> -> vector<4x144xf32>
    %45 = arith.addf %39, %44 : vector<4x144xf32>
    %c0_38 = arith.constant 0 : index
    %c0_39 = arith.constant 0 : index
    %c27 = arith.constant 27 : index
    %46 = vector.load %arg1[%c0_38, %c0_39, %c27] : memref<1x4x360xf32, #tpu.memory_space<vmem>>, vector<1x4x144xf32>
    %47 = vector.shape_cast %46 : vector<1x4x144xf32> to vector<4x144xf32>
    %c7 = arith.constant 7 : index
    %c0_40 = arith.constant 0 : index
    %c0_41 = arith.constant 0 : index
    %48 = vector.load %arg2[%c7, %c0_40, %c0_41] : memref<9x4x4xf32, #tpu.memory_space<vmem>>, vector<1x4x4xf32>
    %49 = vector.shape_cast %48 : vector<1x4x4xf32> to vector<4x4xf32>
    %cst_42 = arith.constant dense<0.000000e+00> : vector<4x144xf32>
    %50 = tpu.matmul %49, %47, %cst_42 {dimension_numbers = #tpu.dot_dimension_numbers<[1], [0], [0], [1], [0, 0, 1, 1], [], []>} : vector<4x4xf32>, vector<4x144xf32>, vector<4x144xf32> -> vector<4x144xf32>
    %51 = arith.addf %45, %50 : vector<4x144xf32>
    %c0_43 = arith.constant 0 : index
    %c0_44 = arith.constant 0 : index
    %c19 = arith.constant 19 : index
    %52 = vector.load %arg1[%c0_43, %c0_44, %c19] : memref<1x4x360xf32, #tpu.memory_space<vmem>>, vector<1x4x144xf32>
    %53 = vector.shape_cast %52 : vector<1x4x144xf32> to vector<4x144xf32>
    %c8 = arith.constant 8 : index
    %c0_45 = arith.constant 0 : index
    %c0_46 = arith.constant 0 : index
    %54 = vector.load %arg2[%c8, %c0_45, %c0_46] : memref<9x4x4xf32, #tpu.memory_space<vmem>>, vector<1x4x4xf32>
    %55 = vector.shape_cast %54 : vector<1x4x4xf32> to vector<4x4xf32>
    %cst_47 = arith.constant dense<0.000000e+00> : vector<4x144xf32>
    %56 = tpu.matmul %55, %53, %cst_47 {dimension_numbers = #tpu.dot_dimension_numbers<[1], [0], [0], [1], [0, 0, 1, 1], [], []>} : vector<4x4xf32>, vector<4x144xf32>, vector<4x144xf32> -> vector<4x144xf32>
    %57 = arith.addf %51, %56 : vector<4x144xf32>
    %c0_48 = arith.constant 0 : index
    %c0_49 = arith.constant 0 : index
    %58 = vector.load %arg3[%c0_48, %c0_49] : memref<1x144xf32, #tpu.memory_space<vmem>>, vector<1x144xf32>
    %59 = vector.broadcast %58 : vector<1x144xf32> to vector<4x144xf32>
    %60 = arith.mulf %57, %59 : vector<4x144xf32>
    %c0_50 = arith.constant 0 : index
    %c0_51 = arith.constant 0 : index
    %c0_52 = arith.constant 0 : index
    %61 = vector.load %arg4[%c0_50, %c0_51, %c0_52] : memref<1x4x144xf32, #tpu.memory_space<vmem>>, vector<1x4x144xf32>
    %62 = vector.shape_cast %61 : vector<1x4x144xf32> to vector<4x144xf32>
    %63 = vector.shape_cast %60 : vector<4x144xf32> to vector<1x4x144xf32>
    tpu.vector_store %arg4[%c0_50, %c0_51, %c0_52], %63 {strides = array<i32>} : memref<1x4x144xf32, #tpu.memory_space<vmem>>, vector<1x4x144xf32>,
    %cst_53 = arith.constant dense<0.000000e+00> : vector<4xf32>
    %64 = vector.multi_reduction <add>, %60, %cst_53 [1] : vector<4x144xf32> to vector<4xf32>
    %65 = vector.shape_cast %64 : vector<4xf32> to vector<4x1xf32>
    %66 = arith.mulf %60, %60 : vector<4x144xf32>
    %cst_54 = arith.constant dense<0.000000e+00> : vector<4xf32>
    %67 = vector.multi_reduction <add>, %66, %cst_54 [1] : vector<4x144xf32> to vector<4xf32>
    %68 = vector.shape_cast %67 : vector<4xf32> to vector<4x1xf32>
    %c0_55 = arith.constant 0 : index
    %c0_56 = arith.constant 0 : index
    %69 = vector.load %arg5[%c0_55, %c0_56] : memref<4x2xf32, #tpu.memory_space<vmem>>, vector<4x2xf32>
    %70 = tpu.concatenate %65, %68 in 1 : vector<4x1xf32>, vector<4x1xf32> -> vector<4x2xf32>
    %71 = arith.addf %69, %70 : vector<4x2xf32>
    %c0_57 = arith.constant 0 : index
    %c0_58 = arith.constant 0 : index
    %72 = vector.load %arg5[%c0_57, %c0_58] : memref<4x2xf32, #tpu.memory_space<vmem>>, vector<4x2xf32>
    tpu.vector_store %arg5[%c0_57, %c0_58], %71 {strides = array<i32>} : memref<4x2xf32, #tpu.memory_space<vmem>>, vector<4x2xf32>,
    return
  }
  func.func @transform_0(%arg0: i32) -> (i32, i32, i32) {
    %c0_i32 = arith.constant 0 : i32
    %c0_i32_0 = arith.constant 0 : i32
    %c0_i32_1 = arith.constant 0 : i32
    return %arg0, %c0_i32, %c0_i32_0 : i32, i32, i32
  }
  func.func @transform_1(%arg0: i32) -> (i32, i32, i32) {
    %c0_i32 = arith.constant 0 : i32
    %c0_i32_0 = arith.constant 0 : i32
    %c0_i32_1 = arith.constant 0 : i32
    %c0_i32_2 = arith.constant 0 : i32
    return %c0_i32, %c0_i32_0, %c0_i32_1 : i32, i32, i32
  }
  func.func @transform_2(%arg0: i32) -> (i32, i32) {
    %c0_i32 = arith.constant 0 : i32
    %c0_i32_0 = arith.constant 0 : i32
    %c0_i32_1 = arith.constant 0 : i32
    return %c0_i32, %c0_i32_0 : i32, i32
  }
  func.func @transform_3(%arg0: i32) -> (i32, i32, i32) {
    %c0_i32 = arith.constant 0 : i32
    %c0_i32_0 = arith.constant 0 : i32
    %c0_i32_1 = arith.constant 0 : i32
    return %arg0, %c0_i32, %c0_i32_0 : i32, i32, i32
  }
  func.func @transform_4(%arg0: i32) -> (i32, i32) {
    %c0_i32 = arith.constant 0 : i32
    %c0_i32_0 = arith.constant 0 : i32
    %c0_i32_1 = arith.constant 0 : i32
    return %c0_i32, %c0_i32_0 : i32, i32
  }
}

module attributes {stable_mosaic.version = 11 : i64} {
  func.func @bn_lrelu_mask_kernel(%arg0: i32, %arg1: memref<1x4x144xf32, #tpu.memory_space<vmem>>, %arg2: memref<4x2xf32, #tpu.memory_space<vmem>>, %arg3: memref<1x144xf32, #tpu.memory_space<vmem>>, %arg4: memref<1x4x144xf32, #tpu.memory_space<vmem>>) attributes {dimension_semantics = [#tpu.dimension_semantics<parallel>], iteration_bounds = array<i64: 2>, scalar_prefetch = 0 : i64, scratch_operands = 0 : i64, tpu.core_type = #tpu.core_type<tc>, window_params = [{transform_indices = @transform_0, window_bounds = array<i64: 1, 4, 144>}, {pipeline_mode = #tpu.pipeline_mode<synchronous>, transform_indices = @transform_1, window_bounds = array<i64: 4, 2>}, {pipeline_mode = #tpu.pipeline_mode<synchronous>, transform_indices = @transform_2, window_bounds = array<i64: 1, 144>}, {transform_indices = @transform_3, window_bounds = array<i64: 1, 4, 144>}]} {
    %c0 = arith.constant 0 : index
    %c0_0 = arith.constant 0 : index
    %c0_1 = arith.constant 0 : index
    %0 = vector.load %arg1[%c0, %c0_0, %c0_1] : memref<1x4x144xf32, #tpu.memory_space<vmem>>, vector<1x4x144xf32>
    %1 = vector.shape_cast %0 : vector<1x4x144xf32> to vector<4x144xf32>
    %c0_2 = arith.constant 0 : index
    %c0_3 = arith.constant 0 : index
    %2 = vector.load %arg2[%c0_2, %c0_3] : memref<4x2xf32, #tpu.memory_space<vmem>>, vector<4x2xf32>
    %3 = vector.extract_strided_slice %2 {offsets = [0, 0], sizes = [4, 1], strides = [1, 1]} : vector<4x2xf32> to vector<4x1xf32>
    %cst = arith.constant 7.812500e-03 : f32
    %4 = vector.broadcast %cst : f32 to vector<4x1xf32>
    %5 = arith.mulf %3, %4 : vector<4x1xf32>
    %6 = vector.extract_strided_slice %2 {offsets = [0, 1], sizes = [4, 1], strides = [1, 1]} : vector<4x2xf32> to vector<4x1xf32>
    %cst_4 = arith.constant 7.812500e-03 : f32
    %7 = vector.broadcast %cst_4 : f32 to vector<4x1xf32>
    %8 = arith.mulf %6, %7 : vector<4x1xf32>
    %9 = arith.mulf %5, %5 : vector<4x1xf32>
    %10 = arith.subf %8, %9 : vector<4x1xf32>
    %cst_5 = arith.constant 0.000000e+00 : f32
    %11 = vector.broadcast %cst_5 : f32 to vector<4x1xf32>
    %12 = arith.maximumf %10, %11 : vector<4x1xf32>
    %13 = vector.broadcast %5 : vector<4x1xf32> to vector<4x144xf32>
    %14 = arith.subf %1, %13 : vector<4x144xf32>
    %cst_6 = arith.constant 9.99999974E-6 : f32
    %15 = vector.broadcast %cst_6 : f32 to vector<4x1xf32>
    %16 = arith.addf %12, %15 : vector<4x1xf32>
    %17 = math.rsqrt %16 : vector<4x1xf32>
    %18 = vector.broadcast %17 : vector<4x1xf32> to vector<4x144xf32>
    %19 = arith.mulf %14, %18 : vector<4x144xf32>
    %cst_7 = arith.constant 0.000000e+00 : f32
    %20 = vector.broadcast %cst_7 : f32 to vector<4x144xf32>
    %21 = arith.cmpf ogt, %19, %20 : vector<4x144xf32>
    %cst_8 = arith.constant 0.00999999977 : f32
    %22 = vector.broadcast %cst_8 : f32 to vector<4x144xf32>
    %23 = arith.mulf %22, %19 : vector<4x144xf32>
    %24 = arith.select %21, %19, %23 : vector<4x144xi1>, vector<4x144xf32>
    %c0_9 = arith.constant 0 : index
    %c0_10 = arith.constant 0 : index
    %25 = vector.load %arg3[%c0_9, %c0_10] : memref<1x144xf32, #tpu.memory_space<vmem>>, vector<1x144xf32>
    %26 = vector.broadcast %25 : vector<1x144xf32> to vector<4x144xf32>
    %27 = arith.mulf %24, %26 : vector<4x144xf32>
    %c0_11 = arith.constant 0 : index
    %c0_12 = arith.constant 0 : index
    %c0_13 = arith.constant 0 : index
    %28 = vector.load %arg4[%c0_11, %c0_12, %c0_13] : memref<1x4x144xf32, #tpu.memory_space<vmem>>, vector<1x4x144xf32>
    %29 = vector.shape_cast %28 : vector<1x4x144xf32> to vector<4x144xf32>
    %30 = vector.shape_cast %27 : vector<4x144xf32> to vector<1x4x144xf32>
    tpu.vector_store %arg4[%c0_11, %c0_12, %c0_13], %30 {strides = array<i32>} : memref<1x4x144xf32, #tpu.memory_space<vmem>>, vector<1x4x144xf32>,
    return
  }
  func.func @transform_0(%arg0: i32) -> (i32, i32, i32) {
    %c0_i32 = arith.constant 0 : i32
    %c0_i32_0 = arith.constant 0 : i32
    %c0_i32_1 = arith.constant 0 : i32
    return %arg0, %c0_i32, %c0_i32_0 : i32, i32, i32
  }
  func.func @transform_1(%arg0: i32) -> (i32, i32) {
    %c0_i32 = arith.constant 0 : i32
    %c0_i32_0 = arith.constant 0 : i32
    %c0_i32_1 = arith.constant 0 : i32
    return %c0_i32, %c0_i32_0 : i32, i32
  }
  func.func @transform_2(%arg0: i32) -> (i32, i32) {
    %c0_i32 = arith.constant 0 : i32
    %c0_i32_0 = arith.constant 0 : i32
    %c0_i32_1 = arith.constant 0 : i32
    return %c0_i32, %c0_i32_0 : i32, i32
  }
  func.func @transform_3(%arg0: i32) -> (i32, i32, i32) {
    %c0_i32 = arith.constant 0 : i32
    %c0_i32_0 = arith.constant 0 : i32
    %c0_i32_1 = arith.constant 0 : i32
    return %arg0, %c0_i32, %c0_i32_0 : i32, i32, i32
  }
}

module attributes {stable_mosaic.version = 11 : i64} {
  func.func @conv1x1_stats_kernel(%arg0: i32, %arg1: i32, %arg2: memref<1x4x144xf32, #tpu.memory_space<vmem>>, %arg3: memref<8x4xf32, #tpu.memory_space<vmem>>, %arg4: memref<8x2xf32, #tpu.memory_space<vmem>>) attributes {dimension_semantics = [#tpu.dimension_semantics<arbitrary>, #tpu.dimension_semantics<arbitrary>], iteration_bounds = array<i64: 2, 1>, scalar_prefetch = 0 : i64, scratch_operands = 0 : i64, tpu.core_type = #tpu.core_type<tc>, window_params = [{transform_indices = @transform_0, window_bounds = array<i64: 1, 4, 144>}, {pipeline_mode = #tpu.pipeline_mode<synchronous>, transform_indices = @transform_1, window_bounds = array<i64: 8, 4>}, {pipeline_mode = #tpu.pipeline_mode<synchronous>, transform_indices = @transform_2, window_bounds = array<i64: 8, 2>}]} {
    %c0_i32 = arith.constant 0 : i32
    %0 = arith.cmpi eq, %arg0, %c0_i32 : i32
    %c0_i32_0 = arith.constant 0 : i32
    %1 = arith.cmpi eq, %arg1, %c0_i32_0 : i32
    %2 = arith.andi %0, %1 : i1
    %3 = arith.extui %2 : i1 to i32
    %c0_i32_1 = arith.constant 0 : i32
    %4 = arith.cmpi ne, %3, %c0_i32_1 : i32
    scf.if %4 {
      %cst_12 = arith.constant 0.000000e+00 : f32
      %18 = vector.broadcast %cst_12 : f32 to vector<8x2xf32>
      %c0_13 = arith.constant 0 : index
      %c0_14 = arith.constant 0 : index
      %19 = vector.load %arg4[%c0_13, %c0_14] : memref<8x2xf32, #tpu.memory_space<vmem>>, vector<8x2xf32>
      tpu.vector_store %arg4[%c0_13, %c0_14], %18 {strides = array<i32>} : memref<8x2xf32, #tpu.memory_space<vmem>>, vector<8x2xf32>,
    } else {
    }
    %c0 = arith.constant 0 : index
    %c0_2 = arith.constant 0 : index
    %5 = vector.load %arg3[%c0, %c0_2] : memref<8x4xf32, #tpu.memory_space<vmem>>, vector<8x4xf32>
    %c0_3 = arith.constant 0 : index
    %c0_4 = arith.constant 0 : index
    %c0_5 = arith.constant 0 : index
    %6 = vector.load %arg2[%c0_3, %c0_4, %c0_5] : memref<1x4x144xf32, #tpu.memory_space<vmem>>, vector<1x4x144xf32>
    %7 = vector.shape_cast %6 : vector<1x4x144xf32> to vector<4x144xf32>
    %cst = arith.constant dense<0.000000e+00> : vector<8x144xf32>
    %8 = tpu.matmul %5, %7, %cst {dimension_numbers = #tpu.dot_dimension_numbers<[1], [0], [0], [1], [0, 0, 1, 1], [], []>} : vector<8x4xf32>, vector<4x144xf32>, vector<8x144xf32> -> vector<8x144xf32>
    %cst_6 = arith.constant dense<0.000000e+00> : vector<8xf32>
    %9 = vector.multi_reduction <add>, %8, %cst_6 [1] : vector<8x144xf32> to vector<8xf32>
    %10 = vector.shape_cast %9 : vector<8xf32> to vector<8x1xf32>
    %11 = arith.mulf %8, %8 : vector<8x144xf32>
    %cst_7 = arith.constant dense<0.000000e+00> : vector<8xf32>
    %12 = vector.multi_reduction <add>, %11, %cst_7 [1] : vector<8x144xf32> to vector<8xf32>
    %13 = vector.shape_cast %12 : vector<8xf32> to vector<8x1xf32>
    %c0_8 = arith.constant 0 : index
    %c0_9 = arith.constant 0 : index
    %14 = vector.load %arg4[%c0_8, %c0_9] : memref<8x2xf32, #tpu.memory_space<vmem>>, vector<8x2xf32>
    %15 = tpu.concatenate %10, %13 in 1 : vector<8x1xf32>, vector<8x1xf32> -> vector<8x2xf32>
    %16 = arith.addf %14, %15 : vector<8x2xf32>
    %c0_10 = arith.constant 0 : index
    %c0_11 = arith.constant 0 : index
    %17 = vector.load %arg4[%c0_10, %c0_11] : memref<8x2xf32, #tpu.memory_space<vmem>>, vector<8x2xf32>
    tpu.vector_store %arg4[%c0_10, %c0_11], %16 {strides = array<i32>} : memref<8x2xf32, #tpu.memory_space<vmem>>, vector<8x2xf32>,
    return
  }
  func.func @transform_0(%arg0: i32, %arg1: i32) -> (i32, i32, i32) {
    %c0_i32 = arith.constant 0 : i32
    %c0_i32_0 = arith.constant 0 : i32
    return %arg0, %c0_i32, %arg1 : i32, i32, i32
  }
  func.func @transform_1(%arg0: i32, %arg1: i32) -> (i32, i32) {
    %c0_i32 = arith.constant 0 : i32
    %c0_i32_0 = arith.constant 0 : i32
    %c0_i32_1 = arith.constant 0 : i32
    return %c0_i32, %c0_i32_0 : i32, i32
  }
  func.func @transform_2(%arg0: i32, %arg1: i32) -> (i32, i32) {
    %c0_i32 = arith.constant 0 : i32
    %c0_i32_0 = arith.constant 0 : i32
    %c0_i32_1 = arith.constant 0 : i32
    return %c0_i32, %c0_i32_0 : i32, i32
  }
}

module attributes {stable_mosaic.version = 11 : i64} {
  func.func @final_kernel(%arg0: i32, %arg1: memref<1x4x144xf32, #tpu.memory_space<vmem>>, %arg2: memref<8x4xf32, #tpu.memory_space<vmem>>, %arg3: memref<8x2xf32, #tpu.memory_space<vmem>>, %arg4: memref<1x4x144xf32, #tpu.memory_space<vmem>>, %arg5: memref<8x4xf32, #tpu.memory_space<vmem>>, %arg6: memref<1x8x144xf32, #tpu.memory_space<vmem>>) attributes {dimension_semantics = [#tpu.dimension_semantics<parallel>], iteration_bounds = array<i64: 2>, scalar_prefetch = 0 : i64, scratch_operands = 0 : i64, tpu.core_type = #tpu.core_type<tc>, window_params = [{transform_indices = @transform_0, window_bounds = array<i64: 1, 4, 144>}, {pipeline_mode = #tpu.pipeline_mode<synchronous>, transform_indices = @transform_1, window_bounds = array<i64: 8, 4>}, {pipeline_mode = #tpu.pipeline_mode<synchronous>, transform_indices = @transform_2, window_bounds = array<i64: 8, 2>}, {transform_indices = @transform_3, window_bounds = array<i64: 1, 4, 144>}, {pipeline_mode = #tpu.pipeline_mode<synchronous>, transform_indices = @transform_4, window_bounds = array<i64: 8, 4>}, {transform_indices = @transform_5, window_bounds = array<i64: 1, 8, 144>}]} {
    %c0 = arith.constant 0 : index
    %c0_0 = arith.constant 0 : index
    %0 = vector.load %arg2[%c0, %c0_0] : memref<8x4xf32, #tpu.memory_space<vmem>>, vector<8x4xf32>
    %c0_1 = arith.constant 0 : index
    %c0_2 = arith.constant 0 : index
    %c0_3 = arith.constant 0 : index
    %1 = vector.load %arg1[%c0_1, %c0_2, %c0_3] : memref<1x4x144xf32, #tpu.memory_space<vmem>>, vector<1x4x144xf32>
    %2 = vector.shape_cast %1 : vector<1x4x144xf32> to vector<4x144xf32>
    %cst = arith.constant dense<0.000000e+00> : vector<8x144xf32>
    %3 = tpu.matmul %0, %2, %cst {dimension_numbers = #tpu.dot_dimension_numbers<[1], [0], [0], [1], [0, 0, 1, 1], [], []>} : vector<8x4xf32>, vector<4x144xf32>, vector<8x144xf32> -> vector<8x144xf32>
    %c0_4 = arith.constant 0 : index
    %c0_5 = arith.constant 0 : index
    %4 = vector.load %arg3[%c0_4, %c0_5] : memref<8x2xf32, #tpu.memory_space<vmem>>, vector<8x2xf32>
    %5 = vector.extract_strided_slice %4 {offsets = [0, 0], sizes = [8, 1], strides = [1, 1]} : vector<8x2xf32> to vector<8x1xf32>
    %cst_6 = arith.constant 7.812500e-03 : f32
    %6 = vector.broadcast %cst_6 : f32 to vector<8x1xf32>
    %7 = arith.mulf %5, %6 : vector<8x1xf32>
    %8 = vector.extract_strided_slice %4 {offsets = [0, 1], sizes = [8, 1], strides = [1, 1]} : vector<8x2xf32> to vector<8x1xf32>
    %cst_7 = arith.constant 7.812500e-03 : f32
    %9 = vector.broadcast %cst_7 : f32 to vector<8x1xf32>
    %10 = arith.mulf %8, %9 : vector<8x1xf32>
    %11 = arith.mulf %7, %7 : vector<8x1xf32>
    %12 = arith.subf %10, %11 : vector<8x1xf32>
    %cst_8 = arith.constant 0.000000e+00 : f32
    %13 = vector.broadcast %cst_8 : f32 to vector<8x1xf32>
    %14 = arith.maximumf %12, %13 : vector<8x1xf32>
    %15 = vector.broadcast %7 : vector<8x1xf32> to vector<8x144xf32>
    %16 = arith.subf %3, %15 : vector<8x144xf32>
    %cst_9 = arith.constant 9.99999974E-6 : f32
    %17 = vector.broadcast %cst_9 : f32 to vector<8x1xf32>
    %18 = arith.addf %14, %17 : vector<8x1xf32>
    %19 = math.rsqrt %18 : vector<8x1xf32>
    %20 = vector.broadcast %19 : vector<8x1xf32> to vector<8x144xf32>
    %21 = arith.mulf %16, %20 : vector<8x144xf32>
    %c0_10 = arith.constant 0 : index
    %c0_11 = arith.constant 0 : index
    %22 = vector.load %arg5[%c0_10, %c0_11] : memref<8x4xf32, #tpu.memory_space<vmem>>, vector<8x4xf32>
    %c0_12 = arith.constant 0 : index
    %c0_13 = arith.constant 0 : index
    %c0_14 = arith.constant 0 : index
    %23 = vector.load %arg4[%c0_12, %c0_13, %c0_14] : memref<1x4x144xf32, #tpu.memory_space<vmem>>, vector<1x4x144xf32>
    %24 = vector.shape_cast %23 : vector<1x4x144xf32> to vector<4x144xf32>
    %cst_15 = arith.constant dense<0.000000e+00> : vector<8x144xf32>
    %25 = tpu.matmul %22, %24, %cst_15 {dimension_numbers = #tpu.dot_dimension_numbers<[1], [0], [0], [1], [0, 0, 1, 1], [], []>} : vector<8x4xf32>, vector<4x144xf32>, vector<8x144xf32> -> vector<8x144xf32>
    %26 = arith.addf %21, %25 : vector<8x144xf32>
    %cst_16 = arith.constant 0.000000e+00 : f32
    %27 = vector.broadcast %cst_16 : f32 to vector<8x144xf32>
    %28 = arith.cmpf ogt, %26, %27 : vector<8x144xf32>
    %cst_17 = arith.constant 0.00999999977 : f32
    %29 = vector.broadcast %cst_17 : f32 to vector<8x144xf32>
    %30 = arith.mulf %29, %26 : vector<8x144xf32>
    %31 = arith.select %28, %26, %30 : vector<8x144xi1>, vector<8x144xf32>
    %c0_18 = arith.constant 0 : index
    %c0_19 = arith.constant 0 : index
    %c0_20 = arith.constant 0 : index
    %32 = vector.load %arg6[%c0_18, %c0_19, %c0_20] : memref<1x8x144xf32, #tpu.memory_space<vmem>>, vector<1x8x144xf32>
    %33 = vector.shape_cast %32 : vector<1x8x144xf32> to vector<8x144xf32>
    %34 = vector.shape_cast %31 : vector<8x144xf32> to vector<1x8x144xf32>
    tpu.vector_store %arg6[%c0_18, %c0_19, %c0_20], %34 {strides = array<i32>} : memref<1x8x144xf32, #tpu.memory_space<vmem>>, vector<1x8x144xf32>,
    return
  }
  func.func @transform_0(%arg0: i32) -> (i32, i32, i32) {
    %c0_i32 = arith.constant 0 : i32
    %c0_i32_0 = arith.constant 0 : i32
    %c0_i32_1 = arith.constant 0 : i32
    return %arg0, %c0_i32, %c0_i32_0 : i32, i32, i32
  }
  func.func @transform_1(%arg0: i32) -> (i32, i32) {
    %c0_i32 = arith.constant 0 : i32
    %c0_i32_0 = arith.constant 0 : i32
    %c0_i32_1 = arith.constant 0 : i32
    return %c0_i32, %c0_i32_0 : i32, i32
  }
  func.func @transform_2(%arg0: i32) -> (i32, i32) {
    %c0_i32 = arith.constant 0 : i32
    %c0_i32_0 = arith.constant 0 : i32
    %c0_i32_1 = arith.constant 0 : i32
    return %c0_i32, %c0_i32_0 : i32, i32
  }
  func.func @transform_3(%arg0: i32) -> (i32, i32, i32) {
    %c0_i32 = arith.constant 0 : i32
    %c0_i32_0 = arith.constant 0 : i32
    %c0_i32_1 = arith.constant 0 : i32
    return %arg0, %c0_i32, %c0_i32_0 : i32, i32, i32
  }
  func.func @transform_4(%arg0: i32) -> (i32, i32) {
    %c0_i32 = arith.constant 0 : i32
    %c0_i32_0 = arith.constant 0 : i32
    %c0_i32_1 = arith.constant 0 : i32
    return %c0_i32, %c0_i32_0 : i32, i32
  }
  func.func @transform_5(%arg0: i32) -> (i32, i32, i32) {
    %c0_i32 = arith.constant 0 : i32
    %c0_i32_0 = arith.constant 0 : i32
    %c0_i32_1 = arith.constant 0 : i32
    return %arg0, %c0_i32, %c0_i32_0 : i32, i32, i32
  }
}

</mosaic_0001>

<bundles_post_ra>
// kernel: disc_block2.7
= control target key start
LH: loop header
LB: loop body
LE: loop exit
PB: predicated region body
PF: predicated region fallthrough
CT: control target
= control target key end

     0   :  { %s494_s12 = smov 0   ;;  %s496_s13 = smov 0   ;;  %s543_s0 = inlined_call_operand.vmem [shape: f32[2,4,256], index: 0, kind: input, shape index: {}]   ;;  %s544_s1 = inlined_call_operand.vmem [shape: f32[4,4], index: 1, kind: input, shape index: {}]   ;;  %s545_s2 = inlined_call_operand.vmem [shape: f32[4,2], index: 2, kind: input, shape index: {}]   ;;  %s546_s3 = inlined_call_operand.vmem [shape: f32[2,4,256], index: 3, kind: output, shape index: {}]  }
   0x1   :  { %s498_s14 = smov 0  }
   0x2 LB: > { %s25_s15 = sadd.s32 1, %s465_s13  ;;  %p402_p0 = scmp.ge.s32.totalorder %s469_s14, 1  ;;  %s469_s14 = sphi %s498_s14, %s13_s14   ;;  %s465_s13 = sphi %s496_s13, %s548_s13   ;;  %s461_s12 = sphi %s494_s12, %s547_s12  }
   0x3   : > { %p27_p1 = scmp.ge.s32.totalorder %s25_s15, 2  ;;  %p158_p2 = scmp.lt.s32.totalorder %s469_s14, 3 }
   0x5   : > { %s550_s15 = smov (%p27_p1, %s25_s15), 0  ;;  %p159_p3 = pnand %p402_p0, %p158_p2 }
   0x6   : > { %s471_s18 = smov (!%p159_p3), 1   ;;  %p191_p4 = scmp.lt.s32.totalorder (!%p159_p3), %s461_s12, 1 }
   0x7   : > { %162 = sbr.rel (%p159_p3) target bundleno = 280 (0x118), region = 32 }
   0xc   : > { %v265_v0 = vld [vmem:[%s545_s2] sm:$0xf]  ;;  %s552_s12 = smov (!%p191_p4, %s461_s12), 1  ;;  %vm220_vm0 = vcmask 1043456   ;;  %vm216_vm1 = vcmask 31744   ;;  %v472_v7 = vmov 0  }
   0xd   : > { %v266_v1 = vmul.f32 0.001953125, %v265_v0  ;;  %s413_s19 = sshll.u32 %s552_s12, 3  ;;  %v210_v6 = vld [vmem:[%s544_s1] sm:$0xf]  ;;  %442 = vset.pattern.permute.xlu0 %v472_v7  ;;  %v473_v8 = vmov 1  }
   0xe   : > { %s198_s22 = scalar_lea.vmem %s543_s0, %s413_s19  ;;  %443 = vset.pattern.permute.xlu1 %v473_v8  ;;  %s208_s27 = scalar_lea.vmem %s546_s3, %s413_s19 }
   0xf   : > { %v267_v2 = vmul.f32 %v266_v1, %v266_v1  ;;  %v211_v3 = vld [vmem:[%s198_s22] sm:$0xff] }
  0x10   : > { %213 = vst [vmem:[#allocation1] ss:$2 sm:$0xff] %v211_v3 }
  0x11   : > { %269 = vrot.lane.b32.xlu0 %v267_v2, %s471_s18 }
  0x17   : > { %v214_v4 = vld.sshfl [vmem:[#allocation1] sm:$0xff pattern:$0x75316420]  ;;  %v215_v5 = vld.sshfl [vmem:[#allocation1 + $0x8] sm:$0xff pattern:$0x75316420] }
  0x18   : > { %407 = vmatpush.msk.msra.mxu0 %vm220_vm0, %v214_v4  ;;  %409 = vmatpush.msk.msra.mxu1 %vm220_vm0, %v215_v5 }
  0x19   : > { %408 = vmatmul.msk.f32.vlgmr.msra.gmra.mxu0 %vm216_vm1, %v210_v6  ;;  %410 = vmatmul.msk.f32.vlgmr.msra.gmra.mxu1 %vm216_vm1, %v210_v6 }
  0x1a   : > { %276 = vperm.xlu0 %442, %v266_v1  }
  0x22   : > { %444 = vset.pattern.permute.xlu0 %v473_v8 }
  0x83   : > { %v270_v9 = vpop.permute.xlu0 %269 }
  0x84   : > { %v272_v10 = vsub.f32 %v266_v1, %v270_v9 }
  0x86   : > { %v273_v11 = vmax.f32 %v272_v10, 0.0 }
  0x88   : > { %v281_v12 = vadd.f32 1e-05, %v273_v11 }
  0x8a   : > { %445 = vrsqrt.f32 %v281_v12  ;;  %vm288_vm3 = vweird.f32 %v281_v12 }
  0x8c   : > { %v277_v20 = vpop.permute.xlu0 %276 }
  0x90   : > { %v446_v13 = vpop.eup %445 }
  0x91   : > { %v283_v14 = vmul.f32 %v446_v13, %v281_v12  ;;  %vm289_vm2 = vweird.f32 %v446_v13 }
  0x92   : > { %vm290_vm4 = vmor %vm288_vm3, %vm289_vm2 }
  0x93   : > { %v284_v15 = vmul.f32 %v446_v13, %v283_v14 }
  0x95   : > { %v285_v16 = vmul.f32 0.5, %v284_v15 }
  0x96   : > { %v242_v21 = vpop.f32.mrf.mxu0  ;;  %v262_v22 = vpop.f32.mrf.mxu1 }
  0x97   : > { %v286_v17 = vsub.f32 1.5, %v285_v16  ;;  %v279_v23 = vsub.f32 %v242_v21, %v277_v20  ;;  %v280_v24 = vsub.f32 %v262_v22, %v277_v20 }
  0x99   : > { %v287_v18 = vmul.f32 %v446_v13, %v286_v17 }
  0x9b   : > { %v291_v19 = vsel %vm290_vm4, %v446_v13, %v287_v18 }
  0x9c   : > { %294 = vperm.xlu1 %443, %v291_v19  }
 0x10e   : > { %v295_v25 = vpop.permute.xlu1 %294 }
 0x10f   : > { %v297_v26 = vmul.f32 %v295_v25, %v279_v23  ;;  %v298_v27 = vmul.f32 %v295_v25, %v280_v24 }
 0x111   : > { %vm300_vm5 = vcmp.gt.f32.partialorder %v298_v27, 0.0  ;;  %v301_v28 = vmul.f32 0.01, %v297_v26  ;;  %v302_v29 = vmul.f32 0.01, %v298_v27  ;;  %vm299_vm6 = vcmp.gt.f32.partialorder %v297_v26, 0.0 }
 0x113   : > { %v304_v30 = vsel %vm300_vm5, %v298_v27, %v302_v29  ;;  %v303_v32 = vsel %vm299_vm6, %v297_v26, %v301_v28 }
 0x114   : > { %v307_v31 = vrot.slane %v304_v30, 4 }
 0x116   : > { %v308_v33 = vsel %vm220_vm0, %v303_v32, %v307_v31 }
 0x117   : > { %310 = vst [vmem:[%s208_s27] sm:$0xff] %v308_v33 }
 0x118 PF: > { %s13_s14 = sadd.s32 1, %s469_s14   ;;  %s547_s12 = smov %s465_s13 }
 0x119   : > { %p10_p5 = scmp.ge.s32.totalorder %s13_s14, 4   ;;  %s548_s13 = smov %s550_s15 }
 0x11b   :  { %12 = sbr.rel (!%p10_p5) target bundleno = 2 (0x2), region = 62 }

// kernel: disc_block2.6
= control target key start
LH: loop header
LB: loop body
LE: loop exit
PB: predicated region body
PF: predicated region fallthrough
CT: control target
= control target key end

     0   :  { %s360_s9 = smov 0   ;;  %s362_s10 = smov 0   ;;  %s408_s0 = inlined_call_operand.vmem [shape: f32[2,4,256], index: 0, kind: input, shape index: {}]   ;;  %s409_s1 = inlined_call_operand.vmem [shape: f32[4,4], index: 1, kind: input, shape index: {}]   ;;  %s410_s2 = inlined_call_operand.vmem [shape: f32[4,2], index: 2, kind: output, shape index: {}]  }
   0x1   :  { %s364_s11 = smov 0  }
   0x2 LB: > { %s24_s12 = sadd.s32 1, %s338_s10  ;;  %p283_p0 = scmp.ge.s32.totalorder %s342_s11, 1  ;;  %s342_s11 = sphi %s364_s11, %s12_s11   ;;  %s338_s10 = sphi %s362_s10, %s412_s10   ;;  %s334_s9 = sphi %s360_s9, %s411_s9  }
   0x3   : > { %p26_p1 = scmp.ge.s32.totalorder %s24_s12, 2  ;;  %p126_p2 = scmp.lt.s32.totalorder %s342_s11, 3 }
   0x5   : > { %s414_s12 = smov (%p26_p1, %s24_s12), 0  ;;  %p127_p3 = pnand %p283_p0, %p126_p2 }
   0x6   : > { %p148_p4 = scmp.lt.s32.totalorder (!%p127_p3), %s334_s9, 1  ;;  %p157_p5 = scmp.eq.s32.totalorder (!%p127_p3), %s334_s9, 0 }
   0x7   : > { %130 = sbr.rel (%p127_p3) target bundleno = 284 (0x11c), region = 28 }
   0xc   : > { %s416_s9 = smov (!%p148_p4, %s334_s9), 1  ;;  %162 = sbr.rel (!%p157_p5) target bundleno = 17 (0x11), region = 32  ;;  %vm163_vm0 = vcmask (%p157_p5), 11264   ;;  %v344_v0 = vmov (%p157_p5), 0.0  }
   0xd   : > { %s293_s13 = sshll.u32 %s416_s9, 3  ;;  %164 = vst.msk [vmem:[%s410_s2] sm:$0xf] (%p157_p5), %vm163_vm0, %v344_v0 }
   0xe   : > { %s155_s16 = scalar_lea.vmem %s408_s0, %s293_s13 }
  0x11 PF: > { %v166_v1 = vld [vmem:[%s155_s16] sm:$0xff]  ;;  %vm175_vm1 = vcmask 1043456   ;;  %vm171_vm2 = vcmask 31744   ;;  %vm233_vm3 = vcmask 7168   ;;  %vm236_vm4 = vcmask 11264  }
  0x12   : > { %168 = vst [vmem:[#allocation1] ss:$2 sm:$0xff] %v166_v1  ;;  %v165_v2 = vld [vmem:[%s409_s1] sm:$0xf] }
  0x14   : > { %v232_v16 = vld [vmem:[%s410_s2] sm:$0xf] }
  0x19   : > { %v169_v3 = vld.sshfl [vmem:[#allocation1] sm:$0xff pattern:$0x75316420]  ;;  %v170_v4 = vld.sshfl [vmem:[#allocation1 + $0x8] sm:$0xff pattern:$0x75316420] }
  0x1a   : > { %287 = vmatpush.msk.msra.mxu0 %vm175_vm1, %v169_v3  ;;  %289 = vmatpush.msk.msra.mxu1 %vm175_vm1, %v170_v4 }
  0x1b   : > { %288 = vmatmul.msk.f32.vlgmr.msra.gmra.mxu0 %vm171_vm2, %v165_v2  ;;  %290 = vmatmul.msk.f32.vlgmr.msra.gmra.mxu1 %vm171_vm2, %v165_v2 }
  0x98   : > { %v197_v5 = vpop.f32.mrf.mxu0  ;;  %v217_v6 = vpop.f32.mrf.mxu1 }
  0x99   : > { %v220_v7 = vsel %vm175_vm1, %v197_v5, 0.0  ;;  %v221_v8 = vsel %vm175_vm1, %v217_v6, 0.0  ;;  %v225_v10 = vmul.f32 %v197_v5, %v197_v5  ;;  %v226_v11 = vmul.f32 %v217_v6, %v217_v6 }
  0x9a   : > { %v222_v9 = vadd.f32 %v221_v8, %v220_v7 }
  0x9b   : > { %v227_v12 = vsel %vm175_vm1, %v225_v10, 0.0  ;;  %v228_v13 = vsel %vm175_vm1, %v226_v11, 0.0 }
  0x9c   : > { %223 = vadd.xlane.f32.xlu0 %v222_v9  ;;  %v229_v14 = vadd.f32 %v228_v13, %v227_v12 }
  0xa4   : > { %230 = vadd.xlane.f32.xlu0 %v229_v14 }
 0x10f   : > { %v224_v15 = vpop.xlane.xlu0 %223 }
 0x117   : > { %v231_v17 = vpop.xlane.xlu0 %230 }
 0x118   : > { %v234_v18 = vsel %vm233_vm3, %v224_v15, %v231_v17 }
 0x119   : > { %v235_v19 = vadd.f32 %v234_v18, %v232_v16 }
 0x11b   : > { %237 = vst.msk [vmem:[%s410_s2] sm:$0xf] %vm236_vm4, %v235_v19 }
 0x11c PF: > { %s12_s11 = sadd.s32 1, %s342_s11   ;;  %s411_s9 = smov %s338_s10 }
 0x11d   : > { %p9_p6 = scmp.ge.s32.totalorder %s12_s11, 4   ;;  %s412_s10 = smov %s414_s12 }
 0x11f   :  { %11 = sbr.rel (!%p9_p6) target bundleno = 2 (0x2), region = 58 }

// kernel: disc_block2.9
= control target key start
LH: loop header
LB: loop body
LE: loop exit
PB: predicated region body
PF: predicated region fallthrough
CT: control target
= control target key end

     0   :  { %s344_s12 = smov 0   ;;  %s371_s0 = inlined_call_operand.vmem [shape: f32[2,4,144], index: 0, kind: input, shape index: {}]   ;;  %s372_s1 = inlined_call_operand.vmem [shape: f32[4,2], index: 1, kind: input, shape index: {}]   ;;  %s373_s2 = inlined_call_operand.vmem [shape: f32[1,144], index: 2, kind: input, shape index: {}]   ;;  %s374_s3 = inlined_call_operand.vmem [shape: f32[2,4,144], index: 3, kind: output, shape index: {}]  }
   0x1 LB: > { %s282_s13 = sadd.s32 4294967295, %s318_s12   ;;  %p286_p0 = scmp.ge.s32.totalorder %s318_s12, 1  ;;  %s318_s12 = sphi %s344_s12, %s13_s12  }
   0x2   : > { %p137_p1 = scmp.lt.s32.totalorder %s318_s12, 3 }
   0x4   : > { %p138_p2 = pnand %p286_p0, %p137_p1 }
   0x5   : > { %s320_s16 = smov (!%p138_p2), 1   ;;  %p161_p3 = scmp.lt.s32.totalorder (!%p138_p2), %s282_s13, 1 }
   0x6   : > { %141 = sbr.rel (%p138_p2) target bundleno = 280 (0x118), region = 32 }
   0xb   : > { %v172_v0 = vld [vmem:[%s372_s1] sm:$0xf]  ;;  %v321_v3 = vmov 0   ;;  %v322_v4 = vmov 1   ;;  %s376_s13 = smov (!%p161_p3, %s282_s13), 1  ;;  %vm220_vm3 = vcmask 1043456  }
   0xc   : > { %v173_v1 = vmul.f32 0.0078125, %v172_v0  ;;  %307 = vset.pattern.permute.xlu0 %v321_v3  ;;  %308 = vset.pattern.permute.xlu1 %v322_v4  ;;  %v323_v16 = vmov 839922192   ;;  %s293_s17 = sshll.u32 %s376_s13, 3  ;;  %v215_v20 = vld [vmem:[%s373_s2] sm:$0x3] }
   0xd   : > { %v186_v17 = vunpack.c.l.s4 %v323_v16  ;;  %s165_s20 = scalar_lea.vmem %s371_s0, %s293_s17  ;;  %v218_v23 = vperm.slane %v215_v20, 1  ;;  %v217_v26 = vperm.slane %v215_v20, 0  ;;  %vm224_vm4 = vcmask 130052   ;;  %s170_s25 = scalar_lea.vmem %s374_s3, %s293_s17 }
   0xe   : > { %v174_v2 = vmul.f32 %v173_v1, %v173_v1  ;;  %v171_v22 = vld [vmem:[%s165_s20] sm:$0xff]  ;;  %vm225_vm6 = vmor %vm224_vm4, %vm220_vm3 }
   0xf   : > { %v187_v18 = vunpack.c.0.s8 %v186_v17  ;;  %v219_v27 = vrot.slane %v218_v23, 4 }
  0x10   : > { %176 = vrot.lane.b32.xlu0 %v174_v2, %s320_s16 }
  0x11   : > { %v221_v30 = vsel %vm220_vm3, %v217_v26, %v219_v27 }
  0x18   : > { %183 = vperm.xlu0 %307, %v173_v1  }
  0x20   : > { %309 = vset.pattern.permute.xlu0 %v322_v4 }
  0x82   : > { %v177_v5 = vpop.permute.xlu0 %176 }
  0x83   : > { %v179_v6 = vsub.f32 %v173_v1, %v177_v5 }
  0x85   : > { %v180_v7 = vmax.f32 %v179_v6, 0.0 }
  0x87   : > { %v191_v8 = vadd.f32 1e-05, %v180_v7 }
  0x89   : > { %310 = vrsqrt.f32 %v191_v8  ;;  %vm198_vm1 = vweird.f32 %v191_v8 }
  0x8a   : > { %v184_v19 = vpop.permute.xlu0 %183 }
  0x8b   : > { %v188_v21 = vperm.slane %v184_v19, %v187_v18 }
  0x8d   : > { %v190_v24 = vsub.f32 %v171_v22, %v188_v21 }
  0x8f   : > { %v311_v9 = vpop.eup %310 }
  0x90   : > { %v193_v10 = vmul.f32 %v311_v9, %v191_v8  ;;  %vm199_vm0 = vweird.f32 %v311_v9 }
  0x91   : > { %vm200_vm2 = vmor %vm198_vm1, %vm199_vm0 }
  0x92   : > { %v194_v11 = vmul.f32 %v311_v9, %v193_v10 }
  0x94   : > { %v195_v12 = vmul.f32 0.5, %v194_v11 }
  0x96   : > { %v196_v13 = vsub.f32 1.5, %v195_v12 }
  0x98   : > { %v197_v14 = vmul.f32 %v311_v9, %v196_v13 }
  0x9a   : > { %v201_v15 = vsel %vm200_vm2, %v311_v9, %v197_v14 }
  0x9b   : > { %204 = vperm.xlu1 %308, %v201_v15  }
 0x10d   : > { %v205_v25 = vpop.permute.xlu1 %204 }
 0x10e   : > { %v209_v28 = vperm.slane %v205_v25, %v187_v18 }
 0x110   : > { %v211_v29 = vmul.f32 %v209_v28, %v190_v24 }
 0x112   : > { %vm212_vm5 = vcmp.gt.f32.partialorder %v211_v29, 0.0  ;;  %v213_v31 = vmul.f32 0.01, %v211_v29 }
 0x114   : > { %v214_v32 = vsel %vm212_vm5, %v211_v29, %v213_v31 }
 0x115   : > { %v223_v33 = vmul.f32 %v221_v30, %v214_v32 }
 0x117   : > { %226 = vst.msk [vmem:[%s170_s25] sm:$0xff] %vm225_vm6, %v223_v33 }
 0x118 PF: > { %s13_s12 = sadd.s32 1, %s318_s12  }
 0x119   : > { %p10_p4 = scmp.ge.s32.totalorder %s13_s12, 4  }
 0x11b   :  { %12 = sbr.rel (!%p10_p4) target bundleno = 1 (0x1), region = 62 }

// kernel: disc_block2.8
= control target key start
LH: loop header
LB: loop body
LE: loop exit
PB: predicated region body
PF: predicated region fallthrough
CT: control target
= control target key end

     0   :  { %s961_s15 = smov 0   ;;  %s1060_s0 = inlined_call_operand.vmem [shape: f32[2,4,360], index: 0, kind: input, shape index: {}]   ;;  %s1061_s1 = inlined_call_operand.vmem [shape: f32[9,4,4], index: 1, kind: input, shape index: {}]   ;;  %s1062_s2 = inlined_call_operand.vmem [shape: f32[1,144], index: 2, kind: input, shape index: {}]   ;;  %s1063_s3 = inlined_call_operand.vmem [shape: f32[2,4,144], index: 3, kind: output, shape index: {0}]   ;;  %s1064_s4 = inlined_call_operand.vmem [shape: f32[4,2], index: 4, kind: output, shape index: {1}]  }
   0x1 LB: > { %s845_s16 = sadd.s32 4294967295, %s925_s15   ;;  %p849_p0 = scmp.ge.s32.totalorder %s925_s15, 1  ;;  %s925_s15 = sphi %s961_s15, %s15_s15  }
   0x2   : > { %p160_p1 = scmp.lt.s32.totalorder %s925_s15, 3 }
   0x4   : > { %p161_p2 = pnand %p849_p0, %p160_p1 }
   0x5   : > { %p186_p3 = scmp.lt.s32.totalorder (!%p161_p2), %s845_s16, 1  ;;  %p853_p4 = scmp.ne.s32.totalorder (!%p161_p2), %s845_s16, 0 }
   0x6   : > { %164 = sbr.rel (%p161_p2) target bundleno = 464 (0x1d0), region = 32 }
   0xb   : > { %s187_s17 = scalar_select %p186_p3, %s845_s16, 1 }
   0xc   : > { %199 = sbr.rel (%p853_p4) target bundleno = 19 (0x13), region = 36 }
   0xd   : > { %s901_s18 = smul.u32 12, %s187_s17  ;;  %s900_s19 = sshll.u32 %s187_s17, 3 }
   0xe   : > { %s972_s22 = scalar_lea.vmem %s1063_s3, %s900_s19 }
   0xf   : > { %s190_s25 = scalar_lea.vmem %s1060_s0, %s901_s18 }
  0x11   : > { %vm200_vm0 = vcmask 11264   ;;  %v927_v0 = vmov 0.0  }
  0x12   : > { %201 = vst.msk [vmem:[%s1064_s4] sm:$0xf] %vm200_vm0, %v927_v0 }
  0x13 PF: > { %v202_v1 = vld [vmem:[%s190_s25] sm:$0xff]  ;;  %s928_s28 = smov 119   ;;  %s929_s29 = smov 127   ;;  %vm220_vm1 = vcmask 1043456   ;;  %vm216_vm2 = vcmask 31744   ;;  %vm214_vm3 = vcmask 973824  }
  0x14   : > { %207 = vst [vmem:[#allocation1] ss:$2 sm:$0xff] %v202_v1  ;;  %v377_v6 = vld [vmem:[%s190_s25 + $0x4] sm:$0xff]  ;;  %s930_s30 = smov 94   ;;  %s931_s5 = smov 85   ;;  %vm388_vm4 = vcmask 769024  }
  0x15   : > { %s932_s6 = smov 93   ;;  %s933_s7 = smov 110   ;;  %v203_v21 = vld [vmem:[%s1061_s1] sm:$0xf]  ;;  %v854_v24 = vld [vmem:[%s1061_s1 + $0x4] sm:$0xf] }
  0x16   : > { %s934_s8 = smov 101   ;;  %s935_s9 = smov 109   ;;  %v868_v28 = vld [vmem:[%s1061_s1 + $0xc] sm:$0xf]  ;;  %vm326_vm5 = vcmask 1039360   ;;  %vm450_vm6 = vcmask 695296  }
  0x17   : > { %v863_v32 = vld [vmem:[%s1061_s1 + $0x8] sm:$0xf]  ;;  %v873_v35 = vld [vmem:[%s1061_s1 + $0x10] sm:$0xf]  ;;  %vm512_vm7 = vcmask 760832   ;;  %vm574_vm8 = vcmask 900096  }
  0x18   : > { %v878_v40 = vld [vmem:[%s1061_s1 + $0x14] sm:$0xf]  ;;  %v883_v42 = vld [vmem:[%s1061_s1 + $0x18] sm:$0xf]  ;;  %vm636_vm9 = vcmask 826368   ;;  %vm698_vm10 = vcmask 891904  }
  0x19   : > { %v888_v46 = vld [vmem:[%s1061_s1 + $0x1c] sm:$0xf]  ;;  %v893_v51 = vld [vmem:[%s1061_s1 + $0x20] sm:$0xf]  ;;  %vm762_vm11 = vcmask 130052   ;;  %vm766_vm12 = vcmask 125952  }
  0x1a   : > { %vm763_vm13 = vmor %vm762_vm11, %vm220_vm1  ;;  %vm779_vm14 = vcmask 7168   ;;  %vm782_vm15 = vcmask 11264  }
  0x1b   : > { %v208_v2 = vld.sshfl [vmem:[#allocation1] sm:$0xff pattern:$0x75316420]  ;;  %v209_v3 = vld.sshfl [vmem:[#allocation1 + $0x8] sm:$0xff pattern:$0x75316420] }
  0x1c   : > { %210 = vrot.lane.b32.xlu0 %v208_v2, %s928_s28  ;;  %265 = vst [vmem:[#allocation1] ss:$2 sm:$0xff] %v202_v1 }
  0x23   : > { %v266_v4 = vld.sshfl [vmem:[#allocation1] sm:$0xff pattern:$0x75316420]  ;;  %v267_v5 = vld.sshfl [vmem:[#allocation1 + $0x8] sm:$0xff pattern:$0x75316420] }
  0x24   : > { %319 = vst [vmem:[#allocation1] ss:$2 sm:$0xff] %v202_v1  ;;  %212 = vrot.lane.b32.xlu0 %v209_v3, %s928_s28  ;;  %859 = vmatpush.msk.msra.mxu2 %vm220_vm1, %v266_v4 }
  0x25   : > { %861 = vmatpush.msk.msra.mxu3 %vm220_vm1, %v267_v5  ;;  %860 = vmatmul.msk.f32.vlgmr.msra.gmra.mxu2 %vm216_vm2, %v203_v21 }
  0x26   : > { %862 = vmatmul.msk.f32.vlgmr.msra.gmra.mxu3 %vm216_vm2, %v203_v21 }
  0x2b   : > { %v320_v7 = vld.sshfl [vmem:[#allocation1] sm:$0xff pattern:$0x75316420]  ;;  %v321_v8 = vld.sshfl [vmem:[#allocation1 + $0x8] sm:$0xff pattern:$0x75316420] }
  0x2c   : > { %322 = vrot.lane.b32.xlu1 %v320_v7, %s929_s29  ;;  %381 = vst [vmem:[#allocation1] ss:$2 sm:$0xff] %v377_v6 }
  0x33   : > { %v382_v9 = vld.sshfl [vmem:[#allocation1] sm:$0xff pattern:$0x75316420]  ;;  %v383_v10 = vld.sshfl [vmem:[#allocation1 + $0x8] sm:$0xff pattern:$0x75316420] }
  0x34   : > { %324 = vrot.lane.b32.xlu1 %v321_v8, %s929_s29  ;;  %443 = vst [vmem:[#allocation1] ss:$2 sm:$0xff] %v377_v6  ;;  %384 = vrot.lane.b32.xlu2 %v382_v9, %s930_s30 }
  0x3b   : > { %v444_v11 = vld.sshfl [vmem:[#allocation1] sm:$0xff pattern:$0x75316420]  ;;  %v445_v12 = vld.sshfl [vmem:[#allocation1 + $0x8] sm:$0xff pattern:$0x75316420] }
  0x3c   : > { %446 = vrot.lane.b32.xlu0 %v444_v11, %s931_s5  ;;  %448 = vrot.lane.b32.xlu1 %v445_v12, %s931_s5  ;;  %505 = vst [vmem:[#allocation1] ss:$2 sm:$0xff] %v377_v6 }
  0x3d   : > { %386 = vrot.lane.b32.xlu2 %v383_v10, %s930_s30 }
  0x43   : > { %v507_v13 = vld.sshfl [vmem:[#allocation1 + $0x8] sm:$0xff pattern:$0x75316420]  ;;  %v506_v14 = vld.sshfl [vmem:[#allocation1] sm:$0xff pattern:$0x75316420] }
  0x44   : > { %510 = vrot.lane.b32.xlu0 %v507_v13, %s932_s6  ;;  %567 = vst [vmem:[#allocation1] ss:$2 sm:$0xff] %v202_v1 }
  0x45   : > { %508 = vrot.lane.b32.xlu2 %v506_v14, %s932_s6  ;;  %v749_v14 = vld [vmem:[%s1062_s2] sm:$0x3] }
  0x4b   : > { %v568_v15 = vld.sshfl [vmem:[#allocation1] sm:$0xff pattern:$0x75316420]  ;;  %v569_v16 = vld.sshfl [vmem:[#allocation1 + $0x8] sm:$0xff pattern:$0x75316420] }
  0x4c   : > { %570 = vrot.lane.b32.xlu1 %v568_v15, %s933_s7  ;;  %629 = vst [vmem:[#allocation1] ss:$2 sm:$0xff] %v202_v1 }
  0x4d   : > { %572 = vrot.lane.b32.xlu2 %v569_v16, %s933_s7 }
  0x53   : > { %v631_v17 = vld.sshfl [vmem:[#allocation1 + $0x8] sm:$0xff pattern:$0x75316420]  ;;  %v630_v18 = vld.sshfl [vmem:[#allocation1] sm:$0xff pattern:$0x75316420] }
  0x54   : > { %634 = vrot.lane.b32.xlu1 %v631_v17, %s934_s8  ;;  %632 = vrot.lane.b32.xlu0 %v630_v18, %s934_s8  ;;  %691 = vst [vmem:[#allocation1] ss:$2 sm:$0xff] %v202_v1 }
  0x5b   : > { %v693_v19 = vld.sshfl [vmem:[#allocation1 + $0x8] sm:$0xff pattern:$0x75316420]  ;;  %v692_v20 = vld.sshfl [vmem:[#allocation1] sm:$0xff pattern:$0x75316420] }
  0x5c   : > { %696 = vrot.lane.b32.xlu0 %v693_v19, %s935_s9  ;;  %694 = vrot.lane.b32.xlu2 %v692_v20, %s935_s9  ;;  %v752_v20 = vperm.slane %v749_v14, 1 }
  0x8e   : > { %v211_v22 = vpop.permute.xlu0 %210  ;;  %v385_v23 = vpop.permute.xlu2 %384 }
  0x96   : > { %v213_v25 = vpop.permute.xlu0 %212 }
  0x97   : > { %v215_v26 = vsel %vm214_vm3, %v211_v22, %v213_v25  ;;  %857 = vmatpush.msk.msra.mxu1 %vm220_vm1, %v213_v25  ;;  %v387_v27 = vpop.permute.xlu2 %386 }
  0x98   : > { %855 = vmatpush.msk.msra.mxu0 %vm220_vm1, %v215_v26  ;;  %858 = vmatmul.msk.f32.vlgmr.msra.gmra.mxu1 %vm216_vm2, %v854_v24  ;;  %v389_v29 = vsel %vm388_vm4, %v385_v23, %v387_v27  ;;  %v751_v23 = vperm.slane %v749_v14, 0 }
  0x99   : > { %856 = vmatmul.msk.f32.vlgmr.msra.gmra.mxu0 %vm216_vm2, %v854_v24  ;;  %869 = vmatpush.msk.msrb.mxu2 %vm220_vm1, %v389_v29 }
  0x9a   : > { %871 = vmatpush.msk.msrb.mxu3 %vm220_vm1, %v387_v27  ;;  %870 = vmatmul.msk.f32.vlgmr.msrb.gmra.mxu2 %vm216_vm2, %v868_v28 }
  0x9b   : > { %872 = vmatmul.msk.f32.vlgmr.msrb.gmra.mxu3 %vm216_vm2, %v868_v28 }
  0x9e   : > { %v323_v30 = vpop.permute.xlu1 %322 }
  0x9f   : > { %v509_v31 = vpop.permute.xlu2 %508 }
  0xa6   : > { %v325_v33 = vpop.permute.xlu1 %324 }
  0xa7   : > { %v327_v34 = vsel %vm326_vm5, %v323_v30, %v325_v33  ;;  %866 = vmatpush.msk.msrb.mxu1 %vm220_vm1, %v325_v33  ;;  %v573_v36 = vpop.permute.xlu2 %572 }
  0xa8   : > { %864 = vmatpush.msk.msrb.mxu0 %vm220_vm1, %v327_v34  ;;  %867 = vmatmul.msk.f32.vlgmr.msrb.gmra.mxu1 %vm216_vm2, %v863_v32  ;;  %v292_v58 = vpop.f32.mrf.mxu2 }
  0xa9   : > { %865 = vmatmul.msk.f32.vlgmr.msrb.gmra.mxu0 %vm216_vm2, %v863_v32  ;;  %v312_v56 = vpop.f32.mrf.mxu3 }
  0xae   : > { %v447_v37 = vpop.permute.xlu0 %446  ;;  %v449_v38 = vpop.permute.xlu1 %448 }
  0xaf   : > { %v451_v39 = vsel %vm450_vm6, %v447_v37, %v449_v38  ;;  %876 = vmatpush.msk.msra.mxu1 %vm220_vm1, %v449_v38 }
  0xb0   : > { %874 = vmatpush.msk.msra.mxu0 %vm220_vm1, %v451_v39  ;;  %877 = vmatmul.msk.f32.vlgmr.msra.gmra.mxu1 %vm216_vm2, %v873_v35  ;;  %v778_v39 = vld [vmem:[%s1064_s4] sm:$0xf] }
  0xb1   : > { %875 = vmatmul.msk.f32.vlgmr.msra.gmra.mxu0 %vm216_vm2, %v873_v35  ;;  %886 = vmatpush.msk.msrb.mxu1 %vm220_vm1, %v573_v36 }
  0xb6   : > { %v511_v41 = vpop.permute.xlu0 %510  ;;  %v695_v50 = vpop.permute.xlu2 %694 }
  0xb7   : > { %v513_v43 = vsel %vm512_vm7, %v509_v31, %v511_v41  ;;  %881 = vmatpush.msk.msra.mxu3 %vm220_vm1, %v511_v41 }
  0xb8   : > { %879 = vmatpush.msk.msra.mxu2 %vm220_vm1, %v513_v43  ;;  %882 = vmatmul.msk.f32.vlgmr.msra.gmra.mxu3 %vm216_vm2, %v878_v40 }
  0xb9   : > { %880 = vmatmul.msk.f32.vlgmr.msra.gmra.mxu2 %vm216_vm2, %v878_v40  ;;  %887 = vmatmul.msk.f32.vlgmr.msrb.gmra.mxu1 %vm216_vm2, %v883_v42 }
  0xbe   : > { %v571_v44 = vpop.permute.xlu1 %570 }
  0xbf   : > { %v575_v45 = vsel %vm574_vm8, %v571_v44, %v573_v36 }
  0xc0   : > { %884 = vmatpush.msk.msrb.mxu0 %vm220_vm1, %v575_v45 }
  0xc1   : > { %885 = vmatmul.msk.f32.vlgmr.msrb.gmra.mxu0 %vm216_vm2, %v883_v42 }
  0xc6   : > { %v635_v47 = vpop.permute.xlu1 %634  ;;  %v633_v48 = vpop.permute.xlu0 %632 }
  0xc7   : > { %v637_v49 = vsel %vm636_vm9, %v633_v48, %v635_v47  ;;  %891 = vmatpush.msk.msrb.mxu3 %vm220_vm1, %v635_v47 }
  0xc8   : > { %889 = vmatpush.msk.msrb.mxu2 %vm220_vm1, %v637_v49  ;;  %892 = vmatmul.msk.f32.vlgmr.msrb.gmra.mxu3 %vm216_vm2, %v888_v46 }
  0xc9   : > { %890 = vmatmul.msk.f32.vlgmr.msrb.gmra.mxu2 %vm216_vm2, %v888_v46 }
  0xce   : > { %v697_v52 = vpop.permute.xlu0 %696 }
  0xcf   : > { %v699_v53 = vsel %vm698_vm10, %v695_v50, %v697_v52  ;;  %896 = vmatpush.msk.msra.mxu1 %vm220_vm1, %v697_v52 }
  0xd0   : > { %894 = vmatpush.msk.msra.mxu0 %vm220_vm1, %v699_v53  ;;  %897 = vmatmul.msk.f32.vlgmr.msra.gmra.mxu1 %vm216_vm2, %v893_v51 }
  0xd1   : > { %895 = vmatmul.msk.f32.vlgmr.msra.gmra.mxu0 %vm216_vm2, %v893_v51 }
 0x115   : > { %v262_v54 = vpop.f32.mrf.mxu1 }
 0x116   : > { %v242_v55 = vpop.f32.mrf.mxu0  ;;  %v313_v60 = vadd.f32 %v312_v56, %v262_v54 }
 0x117   : > { %v293_v61 = vadd.f32 %v292_v58, %v242_v55 }
 0x11d   : > { %v414_v1 = vpop.f32.mrf.mxu2 }
 0x11e   : > { %v434_v62 = vpop.f32.mrf.mxu3 }
 0x125   : > { %v372_v57 = vpop.f32.mrf.mxu1 }
 0x126   : > { %v352_v59 = vpop.f32.mrf.mxu0  ;;  %v376_v0 = vadd.f32 %v372_v57, %v313_v60 }
 0x127   : > { %v375_v2 = vadd.f32 %v352_v59, %v293_v61 }
 0x128   : > { %v438_v4 = vadd.f32 %v434_v62, %v376_v0 }
 0x129   : > { %v437_v5 = vadd.f32 %v414_v1, %v375_v2 }
 0x12d   : > { %v496_v63 = vpop.f32.mrf.mxu1 }
 0x12e   : > { %v476_v3 = vpop.f32.mrf.mxu0  ;;  %v500_v7 = vadd.f32 %v496_v63, %v438_v4 }
 0x12f   : > { %v499_v9 = vadd.f32 %v476_v3, %v437_v5 }
 0x136   : > { %v620_v10 = vpop.f32.mrf.mxu1 }
 0x13b   : > { %v558_v6 = vpop.f32.mrf.mxu3 }
 0x13c   : > { %v538_v8 = vpop.f32.mrf.mxu2  ;;  %v562_v11 = vadd.f32 %v558_v6, %v500_v7 }
 0x13d   : > { %v561_v13 = vadd.f32 %v538_v8, %v499_v9 }
 0x13e   : > { %v600_v12 = vpop.f32.mrf.mxu0  ;;  %v624_v15 = vadd.f32 %v620_v10, %v562_v11 }
 0x13f   : > { %v623_v16 = vadd.f32 %v600_v12, %v561_v13 }
 0x14b   : > { %v682_v17 = vpop.f32.mrf.mxu3 }
 0x14c   : > { %v686_v18 = vadd.f32 %v682_v17, %v624_v15  ;;  %v662_v19 = vpop.f32.mrf.mxu2 }
 0x14d   : > { %v685_v21 = vadd.f32 %v662_v19, %v623_v16  ;;  %v744_v22 = vpop.f32.mrf.mxu1 }
 0x14e   : > { %v748_v24 = vadd.f32 %v744_v22, %v686_v18  ;;  %v724_v25 = vpop.f32.mrf.mxu0 }
 0x14f   : > { %v747_v26 = vadd.f32 %v724_v25, %v685_v21 }
 0x150   : > { %v756_v27 = vmul.f32 %v752_v20, %v748_v24 }
 0x151   : > { %v755_v28 = vmul.f32 %v751_v23, %v747_v26 }
 0x152   : > { %v759_v29 = vrot.slane %v756_v27, 4  ;;  %v767_v30 = vsel %vm766_vm12, %v756_v27, 0.0  ;;  %v772_v31 = vmul.f32 %v756_v27, %v756_v27 }
 0x153   : > { %v765_v32 = vsel %vm220_vm1, %v755_v28, 0.0  ;;  %v771_v33 = vmul.f32 %v755_v28, %v755_v28 }
 0x154   : > { %v760_v34 = vsel %vm220_vm1, %v755_v28, %v759_v29  ;;  %v768_v35 = vadd.f32 %v767_v30, %v765_v32  ;;  %v774_v36 = vsel %vm766_vm12, %v772_v31, 0.0 }
 0x155   : > { %764 = vst.msk [vmem:[%s972_s22] sm:$0xff] %vm763_vm13, %v760_v34  ;;  %v773_v37 = vsel %vm220_vm1, %v771_v33, 0.0 }
 0x156   : > { %769 = vadd.xlane.f32.xlu1 %v768_v35  ;;  %v775_v38 = vadd.f32 %v774_v36, %v773_v37 }
 0x158   : > { %776 = vadd.xlane.f32.xlu2 %v775_v38 }
 0x1c9   : > { %v770_v40 = vpop.xlane.xlu1 %769 }
 0x1cb   : > { %v777_v41 = vpop.xlane.xlu2 %776 }
 0x1cc   : > { %v780_v42 = vsel %vm779_vm14, %v770_v40, %v777_v41 }
 0x1cd   : > { %v781_v43 = vadd.f32 %v780_v42, %v778_v39 }
 0x1cf   : > { %783 = vst.msk [vmem:[%s1064_s4] sm:$0xf] %vm782_vm15, %v781_v43 }
 0x1d0 PF: > { %s15_s15 = sadd.s32 1, %s925_s15  }
 0x1d1   : > { %p12_p5 = scmp.ge.s32.totalorder %s15_s15, 4  }
 0x1d3   :  { %14 = sbr.rel (!%p12_p5) target bundleno = 1 (0x1), region = 82 }

// kernel: disc_block2.10
= control target key start
LH: loop header
LB: loop body
LE: loop exit
PB: predicated region body
PF: predicated region fallthrough
CT: control target
= control target key end

     0   :  { %s359_s9 = smov 0   ;;  %s361_s10 = smov 0   ;;  %s401_s0 = inlined_call_operand.vmem [shape: f32[2,4,144], index: 0, kind: input, shape index: {}]   ;;  %s402_s1 = inlined_call_operand.vmem [shape: f32[8,4], index: 1, kind: input, shape index: {}]   ;;  %s403_s2 = inlined_call_operand.vmem [shape: f32[8,2], index: 2, kind: output, shape index: {}]  }
   0x1   :  { %s363_s11 = smov 0  }
   0x2 LB: > { %s24_s12 = sadd.s32 1, %s337_s10  ;;  %p282_p0 = scmp.ge.s32.totalorder %s341_s11, 1  ;;  %s341_s11 = sphi %s363_s11, %s12_s11   ;;  %s337_s10 = sphi %s361_s10, %s405_s10   ;;  %s333_s9 = sphi %s359_s9, %s404_s9  }
   0x3   : > { %p26_p1 = scmp.ge.s32.totalorder %s24_s12, 2  ;;  %p126_p2 = scmp.lt.s32.totalorder %s341_s11, 3 }
   0x5   : > { %s407_s12 = smov (%p26_p1, %s24_s12), 0  ;;  %p127_p3 = pnand %p282_p0, %p126_p2 }
   0x6   : > { %p148_p4 = scmp.lt.s32.totalorder (!%p127_p3), %s333_s9, 1  ;;  %p157_p5 = scmp.eq.s32.totalorder (!%p127_p3), %s333_s9, 0 }
   0x7   : > { %130 = sbr.rel (%p127_p3) target bundleno = 284 (0x11c), region = 28 }
   0xc   : > { %s409_s9 = smov (!%p148_p4, %s333_s9), 1  ;;  %162 = sbr.rel (!%p157_p5) target bundleno = 17 (0x11), region = 32  ;;  %vm163_vm0 = vcmask (%p157_p5), 15360   ;;  %v343_v0 = vmov (%p157_p5), 0.0  }
   0xd   : > { %s292_s13 = sshll.u32 %s409_s9, 3  ;;  %164 = vst.msk [vmem:[%s403_s2] sm:$0xff] (%p157_p5), %vm163_vm0, %v343_v0 }
   0xe   : > { %s155_s16 = scalar_lea.vmem %s401_s0, %s292_s13 }
  0x11 PF: > { %v166_v1 = vld [vmem:[%s155_s16] sm:$0xff]  ;;  %vm175_vm1 = vcmask 1043456   ;;  %vm171_vm2 = vcmask 31744   ;;  %vm220_vm3 = vcmask 130048   ;;  %vm232_vm4 = vcmask 7168  }
  0x12   : > { %168 = vst [vmem:[#allocation1] ss:$2 sm:$0xff] %v166_v1  ;;  %v165_v2 = vld [vmem:[%s402_s1] sm:$0xff]  ;;  %vm235_vm5 = vcmask 15360  }
  0x14   : > { %v231_v14 = vld [vmem:[%s403_s2] sm:$0xff] }
  0x19   : > { %v170_v3 = vld.sshfl [vmem:[#allocation1 + $0x8] sm:$0xff pattern:$0x75316420]  ;;  %v169_v4 = vld.sshfl [vmem:[#allocation1] sm:$0xff pattern:$0x75316420] }
  0x1a   : > { %288 = vmatpush.msk.msra.mxu1 %vm175_vm1, %v170_v3  ;;  %286 = vmatpush.msk.msra.mxu0 %vm175_vm1, %v169_v4 }
  0x1b   : > { %289 = vmatmul.msk.f32.vlgmr.msra.gmra.mxu1 %vm171_vm2, %v165_v2  ;;  %287 = vmatmul.msk.f32.vlgmr.msra.gmra.mxu0 %vm171_vm2, %v165_v2 }
  0x98   : > { %v217_v5 = vpop.f32.mrf.mxu1  ;;  %v197_v6 = vpop.f32.mrf.mxu0 }
  0x99   : > { %v221_v7 = vsel %vm220_vm3, %v217_v5, 0.0  ;;  %v226_v9 = vmul.f32 %v217_v5, %v217_v5  ;;  %v225_v10 = vmul.f32 %v197_v6, %v197_v6 }
  0x9a   : > { %v222_v8 = vadd.f32 %v221_v7, %v197_v6 }
  0x9b   : > { %v227_v11 = vsel %vm220_vm3, %v226_v9, 0.0 }
  0x9c   : > { %223 = vadd.xlane.f32.xlu0 %v222_v8  ;;  %v228_v12 = vadd.f32 %v227_v11, %v225_v10 }
  0xa4   : > { %229 = vadd.xlane.f32.xlu0 %v228_v12 }
 0x10f   : > { %v224_v13 = vpop.xlane.xlu0 %223 }
 0x117   : > { %v230_v15 = vpop.xlane.xlu0 %229 }
 0x118   : > { %v233_v16 = vsel %vm232_vm4, %v224_v13, %v230_v15 }
 0x119   : > { %v234_v17 = vadd.f32 %v233_v16, %v231_v14 }
 0x11b   : > { %236 = vst.msk [vmem:[%s403_s2] sm:$0xff] %vm235_vm5, %v234_v17 }
 0x11c PF: > { %s12_s11 = sadd.s32 1, %s341_s11   ;;  %s404_s9 = smov %s337_s10 }
 0x11d   : > { %p9_p6 = scmp.ge.s32.totalorder %s12_s11, 4   ;;  %s405_s10 = smov %s407_s12 }
 0x11f   :  { %11 = sbr.rel (!%p9_p6) target bundleno = 2 (0x2), region = 58 }

// kernel: disc_block2.11
= control target key start
LH: loop header
LB: loop body
LE: loop exit
PB: predicated region body
PF: predicated region fallthrough
CT: control target
= control target key end

     0   :  { %s546_s18 = smov 0   ;;  %s579_s0 = inlined_call_operand.vmem [shape: f32[2,4,144], index: 0, kind: input, shape index: {}]   ;;  %s580_s1 = inlined_call_operand.vmem [shape: f32[8,4], index: 1, kind: input, shape index: {}]   ;;  %s581_s2 = inlined_call_operand.vmem [shape: f32[8,2], index: 2, kind: input, shape index: {}]   ;;  %s582_s3 = inlined_call_operand.vmem [shape: f32[2,4,144], index: 3, kind: input, shape index: {}]   ;;  %s583_s4 = inlined_call_operand.vmem [shape: f32[8,4], index: 4, kind: input, shape index: {}]   ;;  %s584_s5 = inlined_call_operand.vmem [shape: f32[2,8,144], index: 5, kind: output, shape index: {}]  }
   0x1 LB: > { %s465_s19 = sadd.s32 4294967295, %s511_s18   ;;  %p469_p0 = scmp.ge.s32.totalorder %s511_s18, 1  ;;  %s511_s18 = sphi %s546_s18, %s15_s18  }
   0x2   : > { %p197_p1 = scmp.lt.s32.totalorder %s511_s18, 3 }
   0x4   : > { %p198_p2 = pnand %p469_p0, %p197_p1 }
   0x5   : > { %s513_s22 = smov (!%p198_p2), 1   ;;  %p230_p3 = scmp.lt.s32.totalorder (!%p198_p2), %s465_s19, 1 }
   0x6   : > { %201 = sbr.rel (%p198_p2) target bundleno = 279 (0x117), region = 40 }
   0xb   : > { %v300_v0 = vld [vmem:[%s581_s2] sm:$0xff]  ;;  %s586_s19 = smov (!%p230_p3, %s465_s19), 1  ;;  %vm255_vm0 = vcmask 1043456   ;;  %vm251_vm1 = vcmask 31744   ;;  %v514_v11 = vmov 0   ;;  %v515_v12 = vmov 1  }
   0xc   : > { %v301_v1 = vmul.f32 0.0078125, %v300_v0  ;;  %s486_s23 = sshll.u32 %s586_s19, 3  ;;  %v334_v9 = vld [vmem:[%s583_s4] sm:$0xff]  ;;  %500 = vset.pattern.permute.xlu0 %v514_v11  ;;  %501 = vset.pattern.permute.xlu1 %v515_v12  ;;  %s488_s9 = sshll.u32 %s586_s19, 4  ;;  %vm396_vm7 = vcmask 130048  }
   0xd   : > { %s234_s26 = scalar_lea.vmem %s579_s0, %s486_s23  ;;  %s239_s29 = scalar_lea.vmem %s582_s3, %s486_s23  ;;  %v245_v10 = vld [vmem:[%s580_s1] sm:$0xff] }
   0xe   : > { %v302_v2 = vmul.f32 %v301_v1, %v301_v1  ;;  %v246_v3 = vld [vmem:[%s234_s26] sm:$0xff]  ;;  %s244_s12 = scalar_lea.vmem %s584_s5, %s488_s9 }
   0xf   : > { %248 = vst [vmem:[#allocation1] ss:$2 sm:$0xff] %v246_v3  ;;  %v335_v6 = vld [vmem:[%s239_s29] sm:$0xff] }
  0x10   : > { %304 = vrot.lane.b32.xlu0 %v302_v2, %s513_s22 }
  0x16   : > { %v249_v4 = vld.sshfl [vmem:[#allocation1] sm:$0xff pattern:$0x75316420]  ;;  %v250_v5 = vld.sshfl [vmem:[#allocation1 + $0x8] sm:$0xff pattern:$0x75316420] }
  0x17   : > { %337 = vst [vmem:[#allocation1] ss:$2 sm:$0xff] %v335_v6  ;;  %476 = vmatpush.msk.msra.mxu0 %vm255_vm0, %v249_v4  ;;  %478 = vmatpush.msk.msra.mxu1 %vm255_vm0, %v250_v5 }
  0x18   : > { %477 = vmatmul.msk.f32.vlgmr.msra.gmra.mxu0 %vm251_vm1, %v245_v10  ;;  %479 = vmatmul.msk.f32.vlgmr.msra.gmra.mxu1 %vm251_vm1, %v245_v10 }
  0x19   : > { %311 = vperm.xlu0 %500, %v301_v1  }
  0x1e   : > { %v338_v7 = vld.sshfl [vmem:[#allocation1] sm:$0xff pattern:$0x75316420]  ;;  %v339_v8 = vld.sshfl [vmem:[#allocation1 + $0x8] sm:$0xff pattern:$0x75316420] }
  0x1f   : > { %480 = vmatpush.msk.msra.mxu2 %vm255_vm0, %v338_v7  ;;  %482 = vmatpush.msk.msra.mxu3 %vm255_vm0, %v339_v8 }
  0x20   : > { %481 = vmatmul.msk.f32.vlgmr.msra.gmra.mxu2 %vm251_vm1, %v334_v9  ;;  %483 = vmatmul.msk.f32.vlgmr.msra.gmra.mxu3 %vm251_vm1, %v334_v9 }
  0x21   : > { %502 = vset.pattern.permute.xlu0 %v515_v12 }
  0x82   : > { %v305_v13 = vpop.permute.xlu0 %304 }
  0x83   : > { %v307_v14 = vsub.f32 %v301_v1, %v305_v13 }
  0x85   : > { %v308_v15 = vmax.f32 %v307_v14, 0.0 }
  0x87   : > { %v316_v16 = vadd.f32 1e-05, %v308_v15 }
  0x89   : > { %503 = vrsqrt.f32 %v316_v16  ;;  %vm323_vm3 = vweird.f32 %v316_v16 }
  0x8b   : > { %v312_v24 = vpop.permute.xlu0 %311 }
  0x8f   : > { %v504_v17 = vpop.eup %503 }
  0x90   : > { %v318_v18 = vmul.f32 %v504_v17, %v316_v16  ;;  %vm324_vm2 = vweird.f32 %v504_v17 }
  0x91   : > { %vm325_vm4 = vmor %vm323_vm3, %vm324_vm2 }
  0x92   : > { %v319_v19 = vmul.f32 %v504_v17, %v318_v18 }
  0x94   : > { %v320_v20 = vmul.f32 0.5, %v319_v19 }
  0x95   : > { %v277_v25 = vpop.f32.mrf.mxu0  ;;  %v297_v26 = vpop.f32.mrf.mxu1 }
  0x96   : > { %v321_v21 = vsub.f32 1.5, %v320_v20  ;;  %v314_v27 = vsub.f32 %v277_v25, %v312_v24  ;;  %v315_v28 = vsub.f32 %v297_v26, %v312_v24 }
  0x98   : > { %v322_v22 = vmul.f32 %v504_v17, %v321_v21 }
  0x9a   : > { %v326_v23 = vsel %vm325_vm4, %v504_v17, %v322_v22 }
  0x9b   : > { %329 = vperm.xlu1 %501, %v326_v23  }
  0xa3   : > { %v364_v29 = vpop.f32.mrf.mxu2  ;;  %v384_v31 = vpop.f32.mrf.mxu3 }
 0x10d   : > { %v330_v30 = vpop.permute.xlu1 %329 }
 0x10e   : > { %v332_v32 = vmul.f32 %v330_v30, %v314_v27  ;;  %v333_v33 = vmul.f32 %v330_v30, %v315_v28 }
 0x110   : > { %v387_v34 = vadd.f32 %v364_v29, %v332_v32  ;;  %v388_v35 = vadd.f32 %v384_v31, %v333_v33 }
 0x112   : > { %vm389_vm5 = vcmp.gt.f32.partialorder %v387_v34, 0.0  ;;  %v391_v36 = vmul.f32 0.01, %v387_v34  ;;  %vm390_vm6 = vcmp.gt.f32.partialorder %v388_v35, 0.0  ;;  %v392_v37 = vmul.f32 0.01, %v388_v35 }
 0x114   : > { %v393_v38 = vsel %vm389_vm5, %v387_v34, %v391_v36  ;;  %v394_v39 = vsel %vm390_vm6, %v388_v35, %v392_v37 }
 0x115   : > { %395 = vst [vmem:[%s244_s12] sm:$0xff] %v393_v38 }
 0x116   : > { %397 = vst.msk [vmem:[%s244_s12 + $0x8] sm:$0xff] %vm396_vm7, %v394_v39 }
 0x117 PF: > { %s15_s18 = sadd.s32 1, %s511_s18  }
 0x118   : > { %p12_p4 = scmp.ge.s32.totalorder %s15_s18, 4  }
 0x11a   :  { %14 = sbr.rel (!%p12_p4) target bundleno = 1 (0x1), region = 73 }

</bundles_post_ra>
